<compile_context>
chip_gen: v7x
topology: tpu7x:2x2x1
jax: 0.10.0
libtpu: 0.0.40
codegen_flags: <defaults>
</compile_context>

<pallas_src>
import functools

import jax
import jax.numpy as jnp
from jax.experimental import pallas as pl
from jax.experimental.pallas import tpu as pltpu

LANE = 128  # TPU lane width


def _round_up(n, m):
    return ((n + m - 1) // m) * m


def mlp_kernel(x_ref, w1_ref, b1_ref, w2_ref, b2_ref, w3_ref, b3_ref, o_ref,
               *, out_size):
    # layer1 + ReLU  (bf16 MXU operands, f32 accumulation, f32 epilogue)
    h1 = jnp.dot(x_ref[...], w1_ref[...],
                 preferred_element_type=jnp.float32) + b1_ref[...]
    h1 = jnp.maximum(h1, 0.0)

    # layer2 + Sigmoid
    h2 = jnp.dot(h1.astype(jnp.bfloat16), w2_ref[...],
                 preferred_element_type=jnp.float32) + b2_ref[...]
    h2 = jax.nn.sigmoid(h2)

    # layer3 + Softmax over features (nn.Softmax() on 2-D input -> dim=1).
    # The output feature dim is padded to 128 lanes (lane-dense stores);
    # padded logit lanes are masked to -inf so they don't pollute max/denom.
    logits = jnp.dot(h2.astype(jnp.bfloat16), w3_ref[...],
                     preferred_element_type=jnp.float32) + b3_ref[...]
    lane_ids = jax.lax.broadcasted_iota(jnp.int32, logits.shape, 1)
    logits = jnp.where(lane_ids < out_size, logits, -jnp.inf)

    m = jnp.max(logits, axis=-1, keepdims=True)
    e = jnp.exp(logits - m)                      # exp(-inf) == 0 on padded lanes
    denom = jnp.sum(e, axis=-1, keepdims=True)
    o_ref[...] = e * pl.reciprocal(denom, approx=True)


def prepare_params(params):
    """One-time padding + bf16 cast of the weights (hoisted off the call path).

    Zero-padding keeps semantics exact: padded hidden cols are 0 after ReLU,
    0.5 after sigmoid but hit zero-padded w3 rows, so nothing leaks. x's
    feature dim is deliberately NOT padded (w1 keeps its real first dim).
    """
    w1, b1, w2, b2, w3, b3 = params
    in_size, hid = w1.shape
    out_size = w3.shape[1]
    hid_p = _round_up(hid, LANE)
    out_p = _round_up(out_size, LANE)

    def pad(a, shape):
        return jnp.zeros(shape, a.dtype).at[:a.shape[0], :a.shape[1]].set(a)

    w1p = pad(w1, (in_size, hid_p)).astype(jnp.bfloat16)
    w2p = pad(w2, (hid_p, hid_p)).astype(jnp.bfloat16)
    w3p = pad(w3, (hid_p, out_p)).astype(jnp.bfloat16)
    b1p = pad(b1, (1, hid_p))   # biases stay f32 (f32 epilogue)
    b2p = pad(b2, (1, hid_p))
    b3p = pad(b3, (1, out_p))
    padded = (w1p, b1p, w2p, b2p, w3p, b3p)
    return padded, out_size


@functools.partial(jax.jit, static_argnames=("out_size", "batch_tile"))
def neural_net01(x, padded_params, *, out_size, batch_tile=1024):
    """Run the Pallas MLP; returns (batch, out_size) f32."""
    w1p, b1p, w2p, b2p, w3p, b3p = padded_params
    batch, in_size = x.shape
    hid_p = w1p.shape[1]
    out_p = w3p.shape[1]

    # Batch tile: multiple of 8 sublanes; ragged last block handled by Pallas.
    bt = min(batch_tile, _round_up(batch, 8))
    grid = pl.cdiv(batch, bt)

    xb = x.astype(jnp.bfloat16)           # only per-call prep; fused under jit

    resident = lambda i: (0, 0)           # constant block index -> stays in VMEM

    out_padded = pl.pallas_call(
        functools.partial(mlp_kernel, out_size=out_size),
        out_shape=jax.ShapeDtypeStruct((batch, out_p), jnp.float32),
        grid=(grid,),
        in_specs=[
            # x: tiled over batch, feature dim left at its real (small) width.
            pl.BlockSpec((bt, in_size), lambda i: (i, 0)),
            pl.BlockSpec((in_size, hid_p), resident),       # w1
            pl.BlockSpec((1, hid_p), resident),             # b1
            pl.BlockSpec((hid_p, hid_p), resident),         # w2
            pl.BlockSpec((1, hid_p), resident),             # b2
            pl.BlockSpec((hid_p, out_p), resident),         # w3
            pl.BlockSpec((1, out_p), resident),             # b3
        ],
        out_specs=pl.BlockSpec((bt, out_p), lambda i: (i, 0)),
        compiler_params=pltpu.CompilerParams(
            dimension_semantics=("parallel",),   # megacore on v7x when grid >= 2
            # Blocks are small even at bt=4096 (~4-5 MiB double-buffered), so
            # 32 MiB is ample and stays safe on v7x's 64 MiB physical VMEM.
            vmem_limit_bytes=32 * 1024 * 1024,
        ),
    )(xb, w1p, b1p, w2p, b2p, w3p, b3p)

    # Slice off padded logit lanes (and nothing else: batch is not padded).
    return out_padded[:, :out_size]


def init_params(key, input_size, hidden_size, output_size):
    """Deterministic init mirroring nn.Linear's U(-1/sqrt(fan_in), +1/sqrt(fan_in))."""
    ks = jax.random.split(key, 6)

    def linear(kw, kb, fan_in, fan_out):
        bound = 1.0 / jnp.sqrt(fan_in)
        w = jax.random.uniform(kw, (fan_in, fan_out), jnp.float32, -bound, bound)
        b = jax.random.uniform(kb, (1, fan_out), jnp.float32, -bound, bound)
        return w, b

    w1, b1 = linear(ks[0], ks[1], input_size, hidden_size)
    w2, b2 = linear(ks[2], ks[3], hidden_size, hidden_size)
    w3, b3 = linear(ks[4], ks[5], hidden_size, output_size)
    return (w1, b1, w2, b2, w3, b3)


def reference(x, params):
    """Pure-JAX reference using the same bf16 MXU-operand quantization."""
    w1, b1, w2, b2, w3, b3 = params
    bf = lambda a: a.astype(jnp.bfloat16).astype(jnp.float32)
    hp = jax.lax.Precision.HIGHEST
    h1 = jnp.maximum(jnp.dot(bf(x), bf(w1), precision=hp) + b1, 0.0)
    h2 = jax.nn.sigmoid(jnp.dot(bf(h1), bf(w2), precision=hp) + b2)
    logits = jnp.dot(bf(h2), bf(w3), precision=hp) + b3
    return jax.nn.softmax(logits, axis=-1)


if __name__ == "__main__":
    key = jax.random.PRNGKey(0)
    k_x, k_p = jax.random.split(key)

    # Toy module shapes; batch=500 with batch_tile=256 exercises 2 grid steps
    # (megacore-friendly) including a ragged last block handled by cdiv grid.
    batch, input_size, hidden_size, output_size = 500, 16, 32, 8
    x = jax.random.normal(k_x, (batch, input_size), jnp.float32)
    params = init_params(k_p, input_size, hidden_size, output_size)

    padded_params, out_size = prepare_params(params)   # one-time, off hot path

    out = neural_net01(x, padded_params, out_size=out_size, batch_tile=256)
    out = jax.block_until_ready(out)

    ref = reference(x, params)
    assert out.shape == (batch, output_size)
    assert bool(jnp.all(jnp.isfinite(out)))            # on the sliced output
    assert jnp.allclose(out, ref, atol=2e-3, rtol=2e-3)
    print("KERNEL_OK")
</pallas_src>

<mosaic_0001>
module attributes {stable_mosaic.version = 11 : i64} {
  func.func @mlp_kernel(%arg0: i32, %arg1: memref<256x16xbf16, #tpu.memory_space<vmem>>, %arg2: memref<16x128xbf16, #tpu.memory_space<vmem>>, %arg3: memref<1x128xf32, #tpu.memory_space<vmem>>, %arg4: memref<128x128xbf16, #tpu.memory_space<vmem>>, %arg5: memref<1x128xf32, #tpu.memory_space<vmem>>, %arg6: memref<128x128xbf16, #tpu.memory_space<vmem>>, %arg7: memref<1x128xf32, #tpu.memory_space<vmem>>, %arg8: memref<256x128xf32, #tpu.memory_space<vmem>>) attributes {dimension_semantics = [#tpu.dimension_semantics<parallel>], iteration_bounds = array<i64: 2>, scalar_prefetch = 0 : i64, scratch_operands = 0 : i64, tpu.core_type = #tpu.core_type<tc>, window_params = [{transform_indices = @transform_0, window_bounds = array<i64: 256, 16>}, {pipeline_mode = #tpu.pipeline_mode<synchronous>, transform_indices = @transform_1, window_bounds = array<i64: 16, 128>}, {pipeline_mode = #tpu.pipeline_mode<synchronous>, transform_indices = @transform_2, window_bounds = array<i64: 1, 128>}, {pipeline_mode = #tpu.pipeline_mode<synchronous>, transform_indices = @transform_3, window_bounds = array<i64: 128, 128>}, {pipeline_mode = #tpu.pipeline_mode<synchronous>, transform_indices = @transform_4, window_bounds = array<i64: 1, 128>}, {pipeline_mode = #tpu.pipeline_mode<synchronous>, transform_indices = @transform_5, window_bounds = array<i64: 128, 128>}, {pipeline_mode = #tpu.pipeline_mode<synchronous>, transform_indices = @transform_6, window_bounds = array<i64: 1, 128>}, {transform_indices = @transform_7, window_bounds = array<i64: 256, 128>}]} {
    %c0 = arith.constant 0 : index
    %c0_0 = arith.constant 0 : index
    %0 = vector.load %arg1[%c0, %c0_0] : memref<256x16xbf16, #tpu.memory_space<vmem>>, vector<256x16xbf16>
    %c0_1 = arith.constant 0 : index
    %c0_2 = arith.constant 0 : index
    %1 = vector.load %arg2[%c0_1, %c0_2] : memref<16x128xbf16, #tpu.memory_space<vmem>>, vector<16x128xbf16>
    %cst = arith.constant dense<0.000000e+00> : vector<256x128xf32>
    %2 = tpu.matmul %0, %1, %cst {dimension_numbers = #tpu.dot_dimension_numbers<[1], [0], [0], [1], [0, 0, 1, 1], [], []>} : vector<256x16xbf16>, vector<16x128xbf16>, vector<256x128xf32> -> vector<256x128xf32>
    %c0_3 = arith.constant 0 : index
    %c0_4 = arith.constant 0 : index
    %3 = vector.load %arg3[%c0_3, %c0_4] : memref<1x128xf32, #tpu.memory_space<vmem>>, vector<1x128xf32>
    %4 = vector.broadcast %3 : vector<1x128xf32> to vector<256x128xf32>
    %5 = arith.addf %2, %4 : vector<256x128xf32>
    %cst_5 = arith.constant 0.000000e+00 : f32
    %6 = vector.broadcast %cst_5 : f32 to vector<256x128xf32>
    %7 = arith.maximumf %5, %6 : vector<256x128xf32>
    %8 = arith.truncf %7 : vector<256x128xf32> to vector<256x128xbf16>
    %c0_6 = arith.constant 0 : index
    %c0_7 = arith.constant 0 : index
    %9 = vector.load %arg4[%c0_6, %c0_7] : memref<128x128xbf16, #tpu.memory_space<vmem>>, vector<128x128xbf16>
    %cst_8 = arith.constant dense<0.000000e+00> : vector<256x128xf32>
    %10 = tpu.matmul %8, %9, %cst_8 {dimension_numbers = #tpu.dot_dimension_numbers<[1], [0], [0], [1], [0, 0, 1, 1], [], []>} : vector<256x128xbf16>, vector<128x128xbf16>, vector<256x128xf32> -> vector<256x128xf32>
    %c0_9 = arith.constant 0 : index
    %c0_10 = arith.constant 0 : index
    %11 = vector.load %arg5[%c0_9, %c0_10] : memref<1x128xf32, #tpu.memory_space<vmem>>, vector<1x128xf32>
    %12 = vector.broadcast %11 : vector<1x128xf32> to vector<256x128xf32>
    %13 = arith.addf %10, %12 : vector<256x128xf32>
    %14 = arith.negf %13 : vector<256x128xf32>
    %15 = math.exp %14 : vector<256x128xf32>
    %cst_11 = arith.constant 1.000000e+00 : f32
    %16 = vector.broadcast %cst_11 : f32 to vector<256x128xf32>
    %17 = arith.addf %16, %15 : vector<256x128xf32>
    %18 = arith.divf %16, %17 : vector<256x128xf32>
    %19 = arith.truncf %18 : vector<256x128xf32> to vector<256x128xbf16>
    %c0_12 = arith.constant 0 : index
    %c0_13 = arith.constant 0 : index
    %20 = vector.load %arg6[%c0_12, %c0_13] : memref<128x128xbf16, #tpu.memory_space<vmem>>, vector<128x128xbf16>
    %cst_14 = arith.constant dense<0.000000e+00> : vector<256x128xf32>
    %21 = tpu.matmul %19, %20, %cst_14 {dimension_numbers = #tpu.dot_dimension_numbers<[1], [0], [0], [1], [0, 0, 1, 1], [], []>} : vector<256x128xbf16>, vector<128x128xbf16>, vector<256x128xf32> -> vector<256x128xf32>
    %c0_15 = arith.constant 0 : index
    %c0_16 = arith.constant 0 : index
    %22 = vector.load %arg7[%c0_15, %c0_16] : memref<1x128xf32, #tpu.memory_space<vmem>>, vector<1x128xf32>
    %23 = vector.broadcast %22 : vector<1x128xf32> to vector<256x128xf32>
    %24 = arith.addf %21, %23 : vector<256x128xf32>
    %25 = tpu.iota {dimensions = array<i32: 1>} : vector<256x128xi32>
    %c8_i32 = arith.constant 8 : i32
    %26 = vector.broadcast %c8_i32 : i32 to vector<256x128xi32>
    %27 = arith.cmpi slt, %25, %26 : vector<256x128xi32>
    %cst_17 = arith.constant 0xFF800000 : f32
    %28 = vector.broadcast %cst_17 : f32 to vector<256x128xf32>
    %29 = arith.select %27, %24, %28 : vector<256x128xi1>, vector<256x128xf32>
    %cst_18 = arith.constant dense<0xFF800000> : vector<256xf32>
    %30 = vector.multi_reduction <maximumf>, %29, %cst_18 [1] : vector<256x128xf32> to vector<256xf32>
    %31 = vector.shape_cast %30 : vector<256xf32> to vector<256x1xf32>
    %32 = vector.broadcast %31 : vector<256x1xf32> to vector<256x128xf32>
    %33 = arith.subf %29, %32 : vector<256x128xf32>
    %34 = math.exp %33 : vector<256x128xf32>
    %cst_19 = arith.constant dense<0.000000e+00> : vector<256xf32>
    %35 = vector.multi_reduction <add>, %34, %cst_19 [1] : vector<256x128xf32> to vector<256xf32>
    %36 = vector.shape_cast %35 : vector<256xf32> to vector<256x1xf32>
    %37 = tpu.reciprocal %36 {approx = true} : vector<256x1xf32> -> vector<256x1xf32>
    %38 = vector.broadcast %37 : vector<256x1xf32> to vector<256x128xf32>
    %39 = arith.mulf %34, %38 : vector<256x128xf32>
    %c0_20 = arith.constant 0 : index
    %c0_21 = arith.constant 0 : index
    %40 = vector.load %arg8[%c0_20, %c0_21] : memref<256x128xf32, #tpu.memory_space<vmem>>, vector<256x128xf32>
    tpu.vector_store %arg8[%c0_20, %c0_21], %39 {strides = array<i32>} : memref<256x128xf32, #tpu.memory_space<vmem>>, vector<256x128xf32>,
    return
  }
  func.func @transform_0(%arg0: i32) -> (i32, i32) {
    %c0_i32 = arith.constant 0 : i32
    %c0_i32_0 = arith.constant 0 : i32
    return %arg0, %c0_i32 : i32, i32
  }
  func.func @transform_1(%arg0: i32) -> (i32, i32) {
    %c0_i32 = arith.constant 0 : i32
    %c0_i32_0 = arith.constant 0 : i32
    %c0_i32_1 = arith.constant 0 : i32
    return %c0_i32, %c0_i32_0 : i32, i32
  }
  func.func @transform_2(%arg0: i32) -> (i32, i32) {
    %c0_i32 = arith.constant 0 : i32
    %c0_i32_0 = arith.constant 0 : i32
    %c0_i32_1 = arith.constant 0 : i32
    return %c0_i32, %c0_i32_0 : i32, i32
  }
  func.func @transform_3(%arg0: i32) -> (i32, i32) {
    %c0_i32 = arith.constant 0 : i32
    %c0_i32_0 = arith.constant 0 : i32
    %c0_i32_1 = arith.constant 0 : i32
    return %c0_i32, %c0_i32_0 : i32, i32
  }
  func.func @transform_4(%arg0: i32) -> (i32, i32) {
    %c0_i32 = arith.constant 0 : i32
    %c0_i32_0 = arith.constant 0 : i32
    %c0_i32_1 = arith.constant 0 : i32
    return %c0_i32, %c0_i32_0 : i32, i32
  }
  func.func @transform_5(%arg0: i32) -> (i32, i32) {
    %c0_i32 = arith.constant 0 : i32
    %c0_i32_0 = arith.constant 0 : i32
    %c0_i32_1 = arith.constant 0 : i32
    return %c0_i32, %c0_i32_0 : i32, i32
  }
  func.func @transform_6(%arg0: i32) -> (i32, i32) {
    %c0_i32 = arith.constant 0 : i32
    %c0_i32_0 = arith.constant 0 : i32
    %c0_i32_1 = arith.constant 0 : i32
    return %c0_i32, %c0_i32_0 : i32, i32
  }
  func.func @transform_7(%arg0: i32) -> (i32, i32) {
    %c0_i32 = arith.constant 0 : i32
    %c0_i32_0 = arith.constant 0 : i32
    return %arg0, %c0_i32 : i32, i32
  }
}

</mosaic_0001>

<bundles_post_ra>
// kernel: neural_net01.1
= control target key start
LH: loop header
LB: loop body
LE: loop exit
PB: predicated region body
PF: predicated region fallthrough
CT: control target
= control target key end

     0   :  { %s2865_s24 = smov 0   ;;  %s2867_s25 = smov 0   ;;  %s3601_s0 = inlined_call_operand.vmem [shape: bf16[500,16], index: 0, kind: input, shape index: {}]   ;;  %s3602_s1 = inlined_call_operand.vmem [shape: bf16[16,128], index: 1, kind: input, shape index: {}]   ;;  %s3603_s2 = inlined_call_operand.vmem [shape: f32[1,128], index: 2, kind: input, shape index: {}]   ;;  %s3604_s3 = inlined_call_operand.vmem [shape: bf16[128,128], index: 3, kind: input, shape index: {}]   ;;  %s3605_s4 = inlined_call_operand.vmem [shape: f32[1,128], index: 4, kind: input, shape index: {}]   ;;  %s3606_s5 = inlined_call_operand.vmem [shape: bf16[128,128], index: 5, kind: input, shape index: {}]   ;;  %s3607_s6 = inlined_call_operand.vmem [shape: f32[1,128], index: 6, kind: input, shape index: {}]   ;;  %s3608_s7 = inlined_call_operand.vmem [shape: f32[500,128], index: 7, kind: output, shape index: {}]  }
   0x1   :  { %s2869_s26 = smov 0  }
   0x2 LB: > { %s2878_s27 = sadd.s32 4294967295, %s2791_s26   ;;  %s2880_s28 = sadd.s32 1, %s2791_s26   ;;  %s2791_s26 = sphi %s2869_s26, %s3617_s26   ;;  %s2787_s25 = sphi %s2867_s25, %s3616_s25   ;;  %s2783_s24 = sphi %s2865_s24, %s3615_s24  }
   0x3   : > { %s173_s29 = ssub.s32 %s2791_s26, %s2880_s28  ;;  %s176_s30 = sadd.s32 1, %s2787_s25 }
   0x4   : > { %p174_p0 = scmp.eq.s32.totalorder %s173_s29, 0  ;;  %p186_p1 = scmp.ne.s32.totalorder %s2787_s25, %s2783_s24 }
   0x5   : > { %p187_p2 = scmp.eq.s32.totalorder %s2878_s27, 1  ;;  %p2055_p3 = scmp.ge.s32.totalorder %s2791_s26, 1 }
   0x6   : > { %s2888_s8 = scalar_select %p174_p0, %s2787_s25, %s176_s30  }
   0x7   : > { %p2890_p4 = por %p187_p2, %p186_p1  ;;  %p246_p5 = scmp.lt.s32.totalorder %s2791_s26, 3 }
   0x9   : > { %p247_p6 = pnand %p2055_p3, %p246_p5 }
   0xa   : > { %v2448_v0 = vld [vmem:[%s3602_s1] sm:$0xff] (!%p247_p6)   ;;  %s2898_s12 = sshll.u32 (!%p247_p6), %s2878_s27, 5  ;;  %vm428_vm0 = vcmask (!%p247_p6), 130048   ;;  %v2466_v8 = vld [vmem:[%s3604_s3 + $0x8] sm:$0xff] (!%p247_p6)   ;;  %v2467_v11 = vld [vmem:[%s3604_s3 + $0x10] sm:$0xff] (!%p247_p6)   ;;  %s278_s26 = sand.u32 (!%p247_p6), 1, %s2783_s24  }
   0xb   : > { %250 = sbr.rel (%p247_p6) target bundleno = 1142 (0x476), region = 48  ;;  %p286_p7 = scmp.lt.s32.totalorder (!%p247_p6), %s2898_s12, 62  ;;  %2228 = vmatprep.subr.bf16.mxu0 (!%p247_p6), %v2448_v0  ;;  %2358 = vmatprep.subr.bf16.mxu1 (!%p247_p6), %v2448_v0  ;;  %v2465_v1 = vld [vmem:[%s3604_s3] sm:$0xff] (!%p247_p6)   ;;  %v2468_v16 = vld [vmem:[%s3604_s3 + $0x18] sm:$0xff] (!%p247_p6)   ;;  %v2470_v21 = vld [vmem:[%s3604_s3 + $0x28] sm:$0xff] (!%p247_p6)  }
   0xc   : > { %2229 = vmatpush3.bf16.msra.mxu0 (!%p247_p6), %v2448_v0  ;;  %2359 = vmatpush3.bf16.msra.mxu1 (!%p247_p6), %v2448_v0  ;;  %v2469_v17 = vld [vmem:[%s3604_s3 + $0x20] sm:$0xff] (!%p247_p6)   ;;  %v2471_v23 = vld [vmem:[%s3604_s3 + $0x30] sm:$0xff] (!%p247_p6)   ;;  %v2472_v24 = vld [vmem:[%s3604_s3 + $0x38] sm:$0xff] (!%p247_p6)   ;;  %s2056_s29 = sshll.u32 (!%p247_p6), %s278_s26, 8 }
   0xd   : > { %2262 = vmatprep.subr.bf16.mxu1 (!%p247_p6), %v2465_v1  ;;  %v2966_v25 = vld [vmem:[%s3603_s2] ss:$0 sm:$0xff] (!%p247_p6)  ;;  %s3397_s30 = scalar_lea.vmem (!%p247_p6), [#allocation2], %s2056_s29  }
  0x12   : > { %s287_s15 = scalar_select %p286_p7, %s2898_s12, 62 }
  0x13   : > { %s1721_s24 = ssub.s32 (%p2890_p4), 63, %s2898_s12  ;;  %s2160_s10 = sshll.u32 (%p2890_p4), %s2878_s27, 8 }
  0x14   : > { %s2058_s16 = sshll.u32 %s287_s15, 2  ;;  %p1722_p8 = scmp.lt.s32.totalorder (%p2890_p4), %s1721_s24, 32 }
  0x15   : > { %s2908_s19 = scalar_lea.vmem %s3601_s0, %s2058_s16  ;;  %s3469_s14 = scalar_lea.vmem (%p2890_p4), %s3608_s7, %s2160_s10  }
  0x16   : > { %v2449_v2 = vld [vmem:[%s2908_s19] sm:$0xff]   ;;  %v2450_v3 = vld [vmem:[%s2908_s19 + $0x8] sm:$0xff]   ;;  %v2451_v4 = vld [vmem:[%s2908_s19 + $0x10] sm:$0xff]  }
  0x17   : > { %2230 = vmatprep.mubr.msk.bf16.mxu0 %vm428_vm0, %v2449_v2  ;;  %v2452_v5 = vld [vmem:[%s2908_s19 + $0x18] sm:$0xff]   ;;  %v2453_v6 = vld [vmem:[%s2908_s19 + $0x20] sm:$0xff]   ;;  %v2458_v9 = vld [vmem:[%s2908_s19 + $0x48] sm:$0xff]  }
  0x18   : > { %2231 = vmatmul.mubr.msk.bf16.vlgmr.msra.gmra.mrb[0].mxu0 %vm428_vm0, %v2450_v3  ;;  %v2457_v7 = vld [vmem:[%s2908_s19 + $0x40] sm:$0xff]   ;;  %v2459_v10 = vld [vmem:[%s2908_s19 + $0x50] sm:$0xff]   ;;  %v2454_v12 = vld [vmem:[%s2908_s19 + $0x28] sm:$0xff]  }
  0x19   : > { %2234 = vmatprep.mubr.msk.bf16.mxu0 %vm428_vm0, %v2451_v4  ;;  %2246 = vmatprep.mubr.msk.bf16.mxu1 %vm428_vm0, %v2457_v7  ;;  %v2455_v13 = vld [vmem:[%s2908_s19 + $0x30] sm:$0xff]   ;;  %v2460_v14 = vld [vmem:[%s2908_s19 + $0x58] sm:$0xff]   ;;  %v2461_v15 = vld [vmem:[%s2908_s19 + $0x60] sm:$0xff]  }
  0x1a   : > { %2247 = vmatmul.mubr.msk.bf16.vlgmr.msra.gmra.mrb[0].mxu1 %vm428_vm0, %v2458_v9  ;;  %v2456_v18 = vld [vmem:[%s2908_s19 + $0x38] sm:$0xff]   ;;  %v2462_v19 = vld [vmem:[%s2908_s19 + $0x68] sm:$0xff]   ;;  %v2463_v20 = vld [vmem:[%s2908_s19 + $0x70] sm:$0xff]  }
  0x1b   : > { %2250 = vmatprep.mubr.msk.bf16.mxu1 %vm428_vm0, %v2459_v10  ;;  %2263 = vmatpush3.bf16.msra.mxu1 %v2465_v1  ;;  %v2464_v22 = vld [vmem:[%s2908_s19 + $0x78] sm:$0xff]  }
  0x1c   : > { %2264 = vmatprep.subr.bf16.mxu1 %v2466_v8 }
  0x1f   : > { %2265 = vmatpush3.bf16.msra.mxu1 %v2466_v8 }
  0x20   : > { %2235 = vmatmul.mubr.msk.bf16.gmra.mrb[4].mxu0 %vm428_vm0, %v2452_v5  ;;  %2266 = vmatprep.subr.bf16.mxu1 %v2467_v11 }
  0x21   : > { %2238 = vmatprep.mubr.msk.bf16.mxu0 %vm428_vm0, %v2453_v6 }
  0x22   : > { %2251 = vmatmul.mubr.msk.bf16.gmra.mrb[4].mxu1 %vm428_vm0, %v2460_v14 }
  0x23   : > { %2254 = vmatprep.mubr.msk.bf16.mxu1 %vm428_vm0, %v2461_v15  ;;  %2267 = vmatpush3.bf16.msra.mxu1 %v2467_v11 }
  0x24   : > { %2268 = vmatprep.subr.bf16.mxu1 %v2468_v16 }
  0x27   : > { %2269 = vmatpush3.bf16.msra.mxu1 %v2468_v16 }
  0x28   : > { %2239 = vmatmul.mubr.msk.bf16.gmra.mrb[8].mxu0 %vm428_vm0, %v2454_v12  ;;  %2270 = vmatprep.subr.bf16.mxu1 %v2469_v17 }
  0x29   : > { %2242 = vmatprep.mubr.msk.bf16.mxu0 %vm428_vm0, %v2455_v13 }
  0x2a   : > { %2255 = vmatmul.mubr.msk.bf16.gmra.mrb[8].mxu1 %vm428_vm0, %v2462_v19 }
  0x2b   : > { %2258 = vmatprep.mubr.msk.bf16.mxu1 %vm428_vm0, %v2463_v20  ;;  %2271 = vmatpush3.bf16.msra.mxu1 %v2469_v17 }
  0x2c   : > { %2272 = vmatprep.subr.bf16.mxu1 %v2470_v21 }
  0x2f   : > { %2273 = vmatpush3.bf16.msra.mxu1 %v2470_v21 }
  0x30   : > { %2243 = vmatmul.mubr.msk.bf16.gmra.mrb[12].mxu0 %vm428_vm0, %v2456_v18  ;;  %2274 = vmatprep.subr.bf16.mxu1 %v2471_v23 }
  0x32   : > { %2259 = vmatmul.mubr.msk.bf16.gmra.mrb[12].mxu1 %vm428_vm0, %v2464_v22 }
  0x33   : > { %2275 = vmatpush3.bf16.msra.mxu1 %v2471_v23 }
  0x34   : > { %2276 = vmatprep.subr.bf16.mxu1 %v2472_v24 }
  0x37   : > { %2277 = vmatpush3.bf16.msra.mxu1 %v2472_v24 }
  0xeb   : > { %v2232_v26 = vpop.f32.mrb[0].mxu0 }
  0xec   : > { %v520_v27 = vadd.f32 %v2232_v26, %v2966_v25  ;;  %v511_v28 = vpop.f32.mrb[1].mxu0 }
  0xed   : > { %v512_v29 = vadd.f32 %v2966_v25, %v511_v28  ;;  %v2233_v30 = vpop.f32.mrb[2].mxu0  ;;  %v2248_v41 = vpop.f32.mrb[0].mxu1 }
  0xee   : > { %v523_v31 = vadd.f32 %v2233_v30, %v2966_v25  ;;  %v514_v32 = vpop.f32.mrb[3].mxu0  ;;  %v640_v34 = vmax.f32 %v520_v27, 0.0  ;;  %v584_v44 = vadd.f32 %v2248_v41, %v2966_v25  ;;  %v575_v45 = vpop.f32.mrb[1].mxu1 }
  0xef   : > { %v515_v33 = vadd.f32 %v2966_v25, %v514_v32  ;;  %v638_v36 = vmax.f32 %v512_v29, 0.0  ;;  %v576_v48 = vadd.f32 %v2966_v25, %v575_v45  ;;  %v2249_v49 = vpop.f32.mrb[2].mxu1 }
  0xf0   : > { %v641_v35 = vmax.f32 %v523_v31, 0.0  ;;  %v656_v53 = vmax.f32 %v584_v44, 0.0  ;;  %v587_v54 = vadd.f32 %v2249_v49, %v2966_v25  ;;  %v578_v55 = vpop.f32.mrb[3].mxu1 }
  0xf1   : > { %v639_v37 = vmax.f32 %v515_v33, 0.0  ;;  %v654_v57 = vmax.f32 %v576_v48, 0.0  ;;  %v579_v58 = vadd.f32 %v2966_v25, %v578_v55 }
  0xf2   : > { %v671_v38 = vpack.c.bf16 %v641_v35, %v640_v34  ;;  %v657_v60 = vmax.f32 %v587_v54, 0.0 }
  0xf3   : > { %v670_v39 = vpack.c.bf16 %v639_v37, %v638_v36  ;;  %v2236_v40 = vpop.f32.mrb[4].mxu0  ;;  %v655_v63 = vmax.f32 %v579_v58, 0.0 }
  0xf4   : > { %v536_v42 = vadd.f32 %v2236_v40, %v2966_v25  ;;  %v527_v43 = vpop.f32.mrb[5].mxu0  ;;  %v2980_v1 = vpack.c.bf16 %v657_v60, %v656_v53 }
  0xf5   : > { %v528_v46 = vadd.f32 %v2966_v25, %v527_v43  ;;  %v2237_v47 = vpop.f32.mrb[6].mxu0  ;;  %2278 = vmatprep.mubr.bf16.mxu1 %v670_v39  ;;  %v2982_v4 = vpack.c.bf16 %v655_v63, %v654_v57  ;;  %v2252_v5 = vpop.f32.mrb[4].mxu1 }
  0xf6   : > { %v644_v50 = vmax.f32 %v536_v42, 0.0  ;;  %v539_v51 = vadd.f32 %v2237_v47, %v2966_v25  ;;  %v530_v52 = vpop.f32.mrb[7].mxu0  ;;  %2279 = vmatmul.mubr.bf16.vlgmr.msra.gmra.mrb[16].mxu1 %v671_v38  ;;  %v600_v8 = vadd.f32 %v2252_v5, %v2966_v25  ;;  %v591_v9 = vpop.f32.mrb[5].mxu1 }
  0xf7   : > { %v531_v56 = vadd.f32 %v2966_v25, %v530_v52  ;;  %v642_v61 = vmax.f32 %v528_v46, 0.0  ;;  %v592_v12 = vadd.f32 %v2966_v25, %v591_v9  ;;  %v2253_v13 = vpop.f32.mrb[6].mxu1 }
  0xf8   : > { %v645_v59 = vmax.f32 %v539_v51, 0.0  ;;  %v660_v17 = vmax.f32 %v600_v8, 0.0  ;;  %v603_v18 = vadd.f32 %v2253_v13, %v2966_v25  ;;  %v594_v19 = vpop.f32.mrb[7].mxu1  ;;  %v2473_v13 = vld [vmem:[%s3606_s5] sm:$0xff]  }
  0xf9   : > { %v643_v62 = vmax.f32 %v531_v56, 0.0  ;;  %v658_v21 = vmax.f32 %v592_v12, 0.0  ;;  %v595_v22 = vadd.f32 %v2966_v25, %v594_v19  ;;  %2310 = vmatprep.subr.bf16.mxu0 %v2473_v13 }
  0xfa   : > { %v673_v0 = vpack.c.bf16 %v645_v59, %v644_v50  ;;  %v661_v24 = vmax.f32 %v603_v18, 0.0  ;;  %2311 = vmatpush3.bf16.msra.mxu0 %v2473_v13  ;;  %v3033_v18 = vld [vmem:[%s3605_s4] ss:$0 sm:$0xff] }
  0xfb   : > { %v672_v2 = vpack.c.bf16 %v643_v62, %v642_v61  ;;  %v2240_v3 = vpop.f32.mrb[8].mxu0  ;;  %v659_v28 = vmax.f32 %v595_v22, 0.0 }
  0xfc   : > { %v552_v6 = vadd.f32 %v2240_v3, %v2966_v25  ;;  %v543_v7 = vpop.f32.mrb[9].mxu0  ;;  %v681_v30 = vpack.c.bf16 %v661_v24, %v660_v17  ;;  %v2480_v17 = vld [vmem:[%s3606_s5 + $0x38] sm:$0xff]  }
  0xfd   : > { %v544_v10 = vadd.f32 %v2966_v25, %v543_v7  ;;  %v2241_v11 = vpop.f32.mrb[10].mxu0  ;;  %2282 = vmatprep.mubr.bf16.mxu1 %v672_v2  ;;  %v680_v33 = vpack.c.bf16 %v659_v28, %v658_v21  ;;  %v2256_v34 = vpop.f32.mrb[8].mxu1 }
  0xfe   : > { %v648_v14 = vmax.f32 %v552_v6, 0.0  ;;  %v555_v15 = vadd.f32 %v2241_v11, %v2966_v25  ;;  %v546_v16 = vpop.f32.mrb[11].mxu0  ;;  %2283 = vmatmul.mubr.bf16.gmra.mrb[20].mxu1 %v673_v0  ;;  %v616_v37 = vadd.f32 %v2256_v34, %v2966_v25  ;;  %v607_v38 = vpop.f32.mrb[9].mxu1 }
  0xff   : > { %v547_v20 = vadd.f32 %v2966_v25, %v546_v16  ;;  %v646_v26 = vmax.f32 %v544_v10, 0.0  ;;  %v608_v41 = vadd.f32 %v2966_v25, %v607_v38  ;;  %v2257_v42 = vpop.f32.mrb[10].mxu1  ;;  %v2479_v16 = vld [vmem:[%s3606_s5 + $0x30] sm:$0xff]  }
 0x100   : > { %v649_v23 = vmax.f32 %v555_v15, 0.0  ;;  %v664_v46 = vmax.f32 %v616_v37, 0.0  ;;  %v619_v47 = vadd.f32 %v2257_v42, %v2966_v25  ;;  %v610_v48 = vpop.f32.mrb[11].mxu1  ;;  %v2478_v15 = vld [vmem:[%s3606_s5 + $0x28] sm:$0xff]  }
 0x101   : > { %v647_v27 = vmax.f32 %v547_v20, 0.0  ;;  %v662_v50 = vmax.f32 %v608_v41, 0.0  ;;  %v611_v51 = vadd.f32 %v2966_v25, %v610_v48 }
 0x102   : > { %v675_v29 = vpack.c.bf16 %v649_v23, %v648_v14  ;;  %v665_v53 = vmax.f32 %v619_v47, 0.0  ;;  %v2477_v14 = vld [vmem:[%s3606_s5 + $0x20] sm:$0xff]  }
 0x103   : > { %v674_v31 = vpack.c.bf16 %v647_v27, %v646_v26  ;;  %v2244_v32 = vpop.f32.mrb[12].mxu0  ;;  %v663_v56 = vmax.f32 %v611_v51, 0.0 }
 0x104   : > { %v568_v35 = vadd.f32 %v2244_v32, %v2966_v25  ;;  %v559_v36 = vpop.f32.mrb[13].mxu0  ;;  %v683_v58 = vpack.c.bf16 %v665_v53, %v664_v46 }
 0x105   : > { %v560_v39 = vadd.f32 %v2966_v25, %v559_v36  ;;  %v2245_v40 = vpop.f32.mrb[14].mxu0  ;;  %2286 = vmatprep.mubr.bf16.mxu1 %v674_v31  ;;  %v682_v60 = vpack.c.bf16 %v663_v56, %v662_v50  ;;  %v2260_v61 = vpop.f32.mrb[12].mxu1 }
 0x106   : > { %v652_v43 = vmax.f32 %v568_v35, 0.0  ;;  %v571_v44 = vadd.f32 %v2245_v40, %v2966_v25  ;;  %v562_v45 = vpop.f32.mrb[15].mxu0  ;;  %2287 = vmatmul.mubr.bf16.gmra.mrb[24].mxu1 %v675_v29  ;;  %v632_v62 = vadd.f32 %v2260_v61, %v2966_v25  ;;  %v623_v63 = vpop.f32.mrb[13].mxu1 }
 0x107   : > { %v563_v49 = vadd.f32 %v2966_v25, %v562_v45  ;;  %v650_v54 = vmax.f32 %v560_v39, 0.0  ;;  %v624_v0 = vadd.f32 %v2966_v25, %v623_v63  ;;  %v2261_v2 = vpop.f32.mrb[14].mxu1 }
 0x108   : > { %v653_v52 = vmax.f32 %v571_v44, 0.0  ;;  %v668_v3 = vmax.f32 %v632_v62, 0.0  ;;  %v635_v5 = vadd.f32 %v2261_v2, %v2966_v25  ;;  %v626_v6 = vpop.f32.mrb[15].mxu1 }
 0x109   : > { %v651_v55 = vmax.f32 %v563_v49, 0.0  ;;  %v666_v7 = vmax.f32 %v624_v0, 0.0  ;;  %v627_v8 = vadd.f32 %v2966_v25, %v626_v6  ;;  %v2474_v25 = vld [vmem:[%s3606_s5 + $0x8] sm:$0xff]  }
 0x10a   : > { %v677_v57 = vpack.c.bf16 %v653_v52, %v652_v43  ;;  %v669_v9 = vmax.f32 %v635_v5, 0.0  ;;  %2312 = vmatprep.subr.bf16.mxu0 %v2474_v25 }
 0x10b   : > { %v676_v59 = vpack.c.bf16 %v651_v55, %v650_v54  ;;  %v667_v10 = vmax.f32 %v627_v8, 0.0  ;;  %2313 = vmatpush3.bf16.msra.mxu0 %v2474_v25 }
 0x10c   : > { %v685_v11 = vpack.c.bf16 %v669_v9, %v668_v3 }
 0x10d   : > { %2290 = vmatprep.mubr.bf16.mxu1 %v676_v59  ;;  %v684_v12 = vpack.c.bf16 %v667_v10, %v666_v7 }
 0x10e   : > { %2291 = vmatmul.mubr.bf16.gmra.mrb[28].mxu1 %v677_v57 }
 0x10f   : > { %2294 = vmatprep.mubr.bf16.mxu1 %v2982_v4  ;;  %v2476_v4 = vld [vmem:[%s3606_s5 + $0x18] sm:$0xff]  }
 0x116   : > { %2295 = vmatmul.mubr.bf16.gmra.mrb[32].mxu1 %v2980_v1  ;;  %v2475_v1 = vld [vmem:[%s3606_s5 + $0x10] sm:$0xff]  }
 0x117   : > { %2298 = vmatprep.mubr.bf16.mxu1 %v680_v33  ;;  %2314 = vmatprep.subr.bf16.mxu0 %v2475_v1 }
 0x118   : > { %2315 = vmatpush3.bf16.msra.mxu0 %v2475_v1 }
 0x119   : > { %2316 = vmatprep.subr.bf16.mxu0 %v2476_v4 }
 0x11c   : > { %2317 = vmatpush3.bf16.msra.mxu0 %v2476_v4 }
 0x11d   : > { %2318 = vmatprep.subr.bf16.mxu0 %v2477_v14 }
 0x11e   : > { %2299 = vmatmul.mubr.bf16.gmra.mrb[36].mxu1 %v681_v30 }
 0x11f   : > { %2302 = vmatprep.mubr.bf16.mxu1 %v682_v60 }
 0x120   : > { %2319 = vmatpush3.bf16.msra.mxu0 %v2477_v14 }
 0x121   : > { %2320 = vmatprep.subr.bf16.mxu0 %v2478_v15 }
 0x124   : > { %2321 = vmatpush3.bf16.msra.mxu0 %v2478_v15 }
 0x125   : > { %2322 = vmatprep.subr.bf16.mxu0 %v2479_v16 }
 0x126   : > { %2303 = vmatmul.mubr.bf16.gmra.mrb[40].mxu1 %v683_v58 }
 0x127   : > { %2306 = vmatprep.mubr.bf16.mxu1 %v684_v12 }
 0x128   : > { %2323 = vmatpush3.bf16.msra.mxu0 %v2479_v16 }
 0x129   : > { %2324 = vmatprep.subr.bf16.mxu0 %v2480_v17 }
 0x12c   : > { %2325 = vmatpush3.bf16.msra.mxu0 %v2480_v17 }
 0x12e   : > { %2307 = vmatmul.mubr.bf16.gmra.mrb[44].mxu1 %v685_v11 }
 0x1c9   : > { %v2280_v19 = vpop.f32.mrb[16].mxu1 }
 0x1ca   : > { %v800_v20 = vadd.f32 %v2280_v19, %v3033_v18  ;;  %v791_v21 = vpop.f32.mrb[17].mxu1 }
 0x1cb   : > { %v792_v22 = vadd.f32 %v3033_v18, %v791_v21  ;;  %v2281_v23 = vpop.f32.mrb[18].mxu1 }
 0x1cc   : > { %v2104_v24 = vmul.f32 -1.442695, %v800_v20  ;;  %v803_v26 = vadd.f32 %v2281_v23, %v3033_v18  ;;  %v794_v27 = vpop.f32.mrb[19].mxu1 }
 0x1cd   : > { %v2102_v28 = vmul.f32 -1.442695, %v792_v22  ;;  %v795_v29 = vadd.f32 %v3033_v18, %v794_v27 }
 0x1ce   : > { %2481 = vpow2.f32 %v2104_v24  ;;  %v2105_v30 = vmul.f32 -1.442695, %v803_v26 }
 0x1cf   : > { %2483 = vpow2.f32 %v2102_v28  ;;  %v2103_v31 = vmul.f32 -1.442695, %v795_v29 }
 0x1d0   : > { %2485 = vpow2.f32 %v2105_v30 }
 0x1d1   : > { %2487 = vpow2.f32 %v2103_v31  ;;  %v2284_v32 = vpop.f32.mrb[20].mxu1 }
 0x1d2   : > { %v816_v33 = vadd.f32 %v2284_v32, %v3033_v18  ;;  %v807_v34 = vpop.f32.mrb[21].mxu1 }
 0x1d3   : > { %v808_v35 = vadd.f32 %v3033_v18, %v807_v34  ;;  %v2285_v36 = vpop.f32.mrb[22].mxu1 }
 0x1d4   : > { %v2108_v37 = vmul.f32 -1.442695, %v816_v33  ;;  %v819_v38 = vadd.f32 %v2285_v36, %v3033_v18  ;;  %v810_v39 = vpop.f32.mrb[23].mxu1 }
 0x1d5   : > { %v2106_v40 = vmul.f32 -1.442695, %v808_v35  ;;  %v811_v41 = vadd.f32 %v3033_v18, %v810_v39 }
 0x1d6   : > { %2489 = vpow2.f32 %v2108_v37  ;;  %v2109_v42 = vmul.f32 -1.442695, %v819_v38 }
 0x1d7   : > { %2491 = vpow2.f32 %v2106_v40  ;;  %v2107_v43 = vmul.f32 -1.442695, %v811_v41 }
 0x1d8   : > { %v2482_v44 = vpop.eup %2481  ;;  %2493 = vpow2.f32 %v2109_v42 }
 0x1d9   : > { %v2484_v45 = vpop.eup %2483  ;;  %v1016_v46 = vadd.f32 1.0, %v2482_v44  ;;  %2495 = vpow2.f32 %v2107_v43  ;;  %v2288_v47 = vpop.f32.mrb[24].mxu1 }
 0x1da   : > { %v2486_v48 = vpop.eup %2485  ;;  %v1014_v49 = vadd.f32 1.0, %v2484_v45  ;;  %v832_v50 = vadd.f32 %v2288_v47, %v3033_v18  ;;  %v823_v51 = vpop.f32.mrb[25].mxu1 }
 0x1db   : > { %v2488_v52 = vpop.eup %2487  ;;  %2497 = vrcp.f32 %v1016_v46  ;;  %v1017_v53 = vadd.f32 1.0, %v2486_v48  ;;  %v824_v54 = vadd.f32 %v3033_v18, %v823_v51  ;;  %v2289_v55 = vpop.f32.mrb[26].mxu1 }
 0x1dc   : > { %2499 = vrcp.f32 %v1014_v49  ;;  %v1015_v56 = vadd.f32 1.0, %v2488_v52  ;;  %v2112_v57 = vmul.f32 -1.442695, %v832_v50  ;;  %v835_v58 = vadd.f32 %v2289_v55, %v3033_v18  ;;  %v826_v59 = vpop.f32.mrb[27].mxu1 }
 0x1dd   : > { %2501 = vrcp.f32 %v1017_v53  ;;  %v2110_v60 = vmul.f32 -1.442695, %v824_v54  ;;  %v827_v61 = vadd.f32 %v3033_v18, %v826_v59 }
 0x1de   : > { %2503 = vrcp.f32 %v1015_v56  ;;  %v2113_v62 = vmul.f32 -1.442695, %v835_v58 }
 0x1df   : > { %2505 = vpow2.f32 %v2112_v57  ;;  %v2111_v63 = vmul.f32 -1.442695, %v827_v61 }
 0x1e0   : > { %v2490_v0 = vpop.eup %2489  ;;  %2507 = vpow2.f32 %v2110_v60 }
 0x1e1   : > { %v2492_v2 = vpop.eup %2491  ;;  %v1020_v3 = vadd.f32 1.0, %v2490_v0  ;;  %2509 = vpow2.f32 %v2113_v62  ;;  %v2292_v5 = vpop.f32.mrb[28].mxu1 }
 0x1e2   : > { %v2494_v6 = vpop.eup %2493  ;;  %v1018_v7 = vadd.f32 1.0, %v2492_v2  ;;  %2511 = vpow2.f32 %v2111_v63  ;;  %v848_v8 = vadd.f32 %v2292_v5, %v3033_v18  ;;  %v839_v9 = vpop.f32.mrb[29].mxu1 }
 0x1e3   : > { %v2496_v10 = vpop.eup %2495  ;;  %2513 = vrcp.f32 %v1020_v3  ;;  %v1021_v11 = vadd.f32 1.0, %v2494_v6  ;;  %v840_v12 = vadd.f32 %v3033_v18, %v839_v9  ;;  %v2293_v13 = vpop.f32.mrb[30].mxu1 }
 0x1e4   : > { %2515 = vrcp.f32 %v1018_v7  ;;  %v1019_v25 = vadd.f32 1.0, %v2496_v10  ;;  %v2116_v1 = vmul.f32 -1.442695, %v848_v8  ;;  %v851_v4 = vadd.f32 %v2293_v13, %v3033_v18  ;;  %v842_v14 = vpop.f32.mrb[31].mxu1 }
 0x1e5   : > { %v2498_v15 = vpop.eup %2497  ;;  %2517 = vrcp.f32 %v1021_v11  ;;  %v2114_v16 = vmul.f32 -1.442695, %v840_v12  ;;  %v843_v17 = vadd.f32 %v3033_v18, %v842_v14 }
 0x1e6   : > { %v2500_v19 = vpop.eup %2499  ;;  %2519 = vrcp.f32 %v1019_v25  ;;  %v2117_v20 = vmul.f32 -1.442695, %v851_v4 }
 0x1e7   : > { %v2502_v21 = vpop.eup %2501  ;;  %2521 = vpow2.f32 %v2116_v1  ;;  %v2115_v22 = vmul.f32 -1.442695, %v843_v17 }
 0x1e8   : > { %v2504_v23 = vpop.eup %2503  ;;  %2523 = vpow2.f32 %v2114_v16  ;;  %v1111_v24 = vpack.c.bf16 %v2502_v21, %v2498_v15 }
 0x1e9   : > { %v2506_v26 = vpop.eup %2505  ;;  %2525 = vpow2.f32 %v2117_v20  ;;  %v2296_v27 = vpop.f32.mrb[32].mxu1  ;;  %v1110_v28 = vpack.c.bf16 %v2504_v23, %v2500_v19 }
 0x1ea   : > { %v2508_v29 = vpop.eup %2507  ;;  %v1024_v30 = vadd.f32 1.0, %v2506_v26  ;;  %2527 = vpow2.f32 %v2115_v22  ;;  %v864_v31 = vadd.f32 %v2296_v27, %v3033_v18  ;;  %v855_v32 = vpop.f32.mrb[33].mxu1 }
 0x1eb   : > { %v2510_v33 = vpop.eup %2509  ;;  %v1022_v34 = vadd.f32 1.0, %v2508_v29  ;;  %v856_v35 = vadd.f32 %v3033_v18, %v855_v32  ;;  %v2297_v36 = vpop.f32.mrb[34].mxu1  ;;  %2326 = vmatprep.mubr.bf16.mxu0 %v1110_v28 }
 0x1ec   : > { %v2512_v37 = vpop.eup %2511  ;;  %2529 = vrcp.f32 %v1024_v30  ;;  %v1025_v38 = vadd.f32 1.0, %v2510_v33  ;;  %v2120_v39 = vmul.f32 -1.442695, %v864_v31  ;;  %v867_v40 = vadd.f32 %v2297_v36, %v3033_v18  ;;  %v858_v41 = vpop.f32.mrb[35].mxu1  ;;  %2327 = vmatmul.mubr.bf16.vlgmr.msra.gmra.mrb[16].mxu0 %v1111_v24 }
 0x1ed   : > { %v2514_v42 = vpop.eup %2513  ;;  %2531 = vrcp.f32 %v1022_v34  ;;  %v1023_v43 = vadd.f32 1.0, %v2512_v37  ;;  %v2118_v44 = vmul.f32 -1.442695, %v856_v35  ;;  %v859_v45 = vadd.f32 %v3033_v18, %v858_v41 }
 0x1ee   : > { %v2516_v46 = vpop.eup %2515  ;;  %2533 = vrcp.f32 %v1025_v38  ;;  %v2121_v47 = vmul.f32 -1.442695, %v867_v40 }
 0x1ef   : > { %v2518_v48 = vpop.eup %2517  ;;  %2535 = vrcp.f32 %v1023_v43  ;;  %v2119_v49 = vmul.f32 -1.442695, %v859_v45 }
 0x1f0   : > { %v2520_v50 = vpop.eup %2519  ;;  %2537 = vpow2.f32 %v2120_v39  ;;  %v1113_v51 = vpack.c.bf16 %v2518_v48, %v2514_v42 }
 0x1f1   : > { %v2522_v52 = vpop.eup %2521  ;;  %2539 = vpow2.f32 %v2118_v44  ;;  %v2300_v53 = vpop.f32.mrb[36].mxu1  ;;  %v1112_v54 = vpack.c.bf16 %v2520_v50, %v2516_v46 }
 0x1f2   : > { %v2524_v55 = vpop.eup %2523  ;;  %v1028_v56 = vadd.f32 1.0, %v2522_v52  ;;  %2541 = vpow2.f32 %v2121_v47  ;;  %v880_v57 = vadd.f32 %v2300_v53, %v3033_v18  ;;  %v871_v58 = vpop.f32.mrb[37].mxu1 }
 0x1f3   : > { %v2526_v59 = vpop.eup %2525  ;;  %v1026_v60 = vadd.f32 1.0, %v2524_v55  ;;  %2543 = vpow2.f32 %v2119_v49  ;;  %v872_v61 = vadd.f32 %v3033_v18, %v871_v58  ;;  %v2301_v62 = vpop.f32.mrb[38].mxu1  ;;  %2330 = vmatprep.mubr.bf16.mxu0 %v1112_v54 }
 0x1f4   : > { %v2528_v63 = vpop.eup %2527  ;;  %2545 = vrcp.f32 %v1028_v56  ;;  %v1029_v0 = vadd.f32 1.0, %v2526_v59  ;;  %v2124_v2 = vmul.f32 -1.442695, %v880_v57  ;;  %v883_v3 = vadd.f32 %v2301_v62, %v3033_v18  ;;  %v874_v5 = vpop.f32.mrb[39].mxu1  ;;  %2331 = vmatmul.mubr.bf16.gmra.mrb[20].mxu0 %v1113_v51 }
 0x1f5   : > { %2547 = vrcp.f32 %v1026_v60  ;;  %v1027_v6 = vadd.f32 1.0, %v2528_v63  ;;  %v2122_v7 = vmul.f32 -1.442695, %v872_v61  ;;  %v875_v8 = vadd.f32 %v3033_v18, %v874_v5 }
 0x1f6   : > { %v2530_v9 = vpop.eup %2529  ;;  %2549 = vrcp.f32 %v1029_v0  ;;  %v2125_v10 = vmul.f32 -1.442695, %v883_v3 }
 0x1f7   : > { %v2532_v11 = vpop.eup %2531  ;;  %2551 = vrcp.f32 %v1027_v6  ;;  %v2123_v12 = vmul.f32 -1.442695, %v875_v8 }
 0x1f8   : > { %v2534_v13 = vpop.eup %2533  ;;  %2553 = vpow2.f32 %v2124_v2 }
 0x1f9   : > { %v2536_v25 = vpop.eup %2535  ;;  %2555 = vpow2.f32 %v2122_v7  ;;  %v2304_v1 = vpop.f32.mrb[40].mxu1  ;;  %v1115_v4 = vpack.c.bf16 %v2534_v13, %v2530_v9 }
 0x1fa   : > { %v2538_v14 = vpop.eup %2537  ;;  %2557 = vpow2.f32 %v2125_v10  ;;  %v896_v15 = vadd.f32 %v2304_v1, %v3033_v18  ;;  %v887_v16 = vpop.f32.mrb[41].mxu1  ;;  %v1114_v17 = vpack.c.bf16 %v2536_v25, %v2532_v11 }
 0x1fb   : > { %v2540_v19 = vpop.eup %2539  ;;  %v1032_v20 = vadd.f32 1.0, %v2538_v14  ;;  %2559 = vpow2.f32 %v2123_v12  ;;  %v888_v21 = vadd.f32 %v3033_v18, %v887_v16  ;;  %v2305_v22 = vpop.f32.mrb[42].mxu1 }
 0x1fc   : > { %v2542_v23 = vpop.eup %2541  ;;  %v1030_v24 = vadd.f32 1.0, %v2540_v19  ;;  %v899_v26 = vadd.f32 %v2305_v22, %v3033_v18  ;;  %2334 = vmatprep.mubr.bf16.mxu0 %v1114_v17  ;;  %v890_v27 = vpop.f32.mrb[43].mxu1  ;;  %v2128_v30 = vmul.f32 -1.442695, %v896_v15 }
 0x1fd   : > { %v2544_v28 = vpop.eup %2543  ;;  %2561 = vrcp.f32 %v1032_v20  ;;  %v1033_v29 = vadd.f32 1.0, %v2542_v23  ;;  %v891_v31 = vadd.f32 %v3033_v18, %v890_v27  ;;  %2335 = vmatmul.mubr.bf16.gmra.mrb[24].mxu0 %v1115_v4  ;;  %v2126_v34 = vmul.f32 -1.442695, %v888_v21 }
 0x1fe   : > { %v2546_v32 = vpop.eup %2545  ;;  %2563 = vrcp.f32 %v1030_v24  ;;  %v1031_v33 = vadd.f32 1.0, %v2544_v28  ;;  %v2129_v36 = vmul.f32 -1.442695, %v899_v26 }
 0x1ff   : > { %v2548_v35 = vpop.eup %2547  ;;  %2565 = vrcp.f32 %v1033_v29  ;;  %v2127_v38 = vmul.f32 -1.442695, %v891_v31 }
 0x200   : > { %v2550_v37 = vpop.eup %2549  ;;  %2567 = vrcp.f32 %v1031_v33 }
 0x201   : > { %v2552_v39 = vpop.eup %2551  ;;  %2569 = vpow2.f32 %v2128_v30  ;;  %v2308_v40 = vpop.f32.mrb[44].mxu1  ;;  %v1117_v41 = vpack.c.bf16 %v2550_v37, %v2546_v32 }
 0x202   : > { %v2554_v42 = vpop.eup %2553  ;;  %2571 = vpow2.f32 %v2126_v34  ;;  %v912_v43 = vadd.f32 %v2308_v40, %v3033_v18  ;;  %v903_v44 = vpop.f32.mrb[45].mxu1  ;;  %v1116_v45 = vpack.c.bf16 %v2552_v39, %v2548_v35  ;;  %v3072_v40 = vld [vmem:[%s3607_s6] ss:$0 sm:$0xff] }
 0x203   : > { %v2556_v46 = vpop.eup %2555  ;;  %v1036_v47 = vadd.f32 1.0, %v2554_v42  ;;  %2573 = vpow2.f32 %v2129_v36  ;;  %v904_v48 = vadd.f32 %v3033_v18, %v903_v44  ;;  %v2309_v49 = vpop.f32.mrb[46].mxu1 }
 0x204   : > { %v2558_v50 = vpop.eup %2557  ;;  %v1034_v51 = vadd.f32 1.0, %v2556_v46  ;;  %2575 = vpow2.f32 %v2127_v38  ;;  %v915_v52 = vadd.f32 %v2309_v49, %v3033_v18  ;;  %2338 = vmatprep.mubr.bf16.mxu0 %v1116_v45  ;;  %v906_v53 = vpop.f32.mrb[47].mxu1  ;;  %v2132_v56 = vmul.f32 -1.442695, %v912_v43 }
 0x205   : > { %v2560_v54 = vpop.eup %2559  ;;  %2577 = vrcp.f32 %v1036_v47  ;;  %v1037_v55 = vadd.f32 1.0, %v2558_v50  ;;  %v907_v57 = vadd.f32 %v3033_v18, %v906_v53  ;;  %2339 = vmatmul.mubr.bf16.gmra.mrb[28].mxu0 %v1117_v41  ;;  %v2130_v59 = vmul.f32 -1.442695, %v904_v48 }
 0x206   : > { %2579 = vrcp.f32 %v1034_v51  ;;  %v1035_v58 = vadd.f32 1.0, %v2560_v54  ;;  %v2133_v61 = vmul.f32 -1.442695, %v915_v52  ;;  %v1358_v38 = vlaneseq }
 0x207   : > { %v2562_v60 = vpop.eup %2561  ;;  %2581 = vrcp.f32 %v1037_v55  ;;  %v2131_v63 = vmul.f32 -1.442695, %v907_v57 }
 0x208   : > { %v2564_v62 = vpop.eup %2563  ;;  %2583 = vrcp.f32 %v1035_v58  ;;  %v3067_v39 = vand.u32 127, %v1358_v38 }
 0x209   : > { %v2566_v0 = vpop.eup %2565  ;;  %2585 = vpow2.f32 %v2132_v56 }
 0x20a   : > { %v2568_v2 = vpop.eup %2567  ;;  %2587 = vpow2.f32 %v2130_v59  ;;  %v1119_v3 = vpack.c.bf16 %v2566_v0, %v2562_v60  ;;  %vm1360_vm1 = vcmp.lt.s32.totalorder %v3067_v39, 8 }
 0x20b   : > { %v2570_v5 = vpop.eup %2569  ;;  %2589 = vpow2.f32 %v2133_v61  ;;  %v1118_v6 = vpack.c.bf16 %v2568_v2, %v2564_v62 }
 0x20c   : > { %v2572_v7 = vpop.eup %2571  ;;  %v1040_v18 = vadd.f32 1.0, %v2570_v5  ;;  %2591 = vpow2.f32 %v2131_v63 }
 0x20d   : > { %v2574_v8 = vpop.eup %2573  ;;  %v1038_v9 = vadd.f32 1.0, %v2572_v7  ;;  %2342 = vmatprep.mubr.bf16.mxu0 %v1118_v6 }
 0x20e   : > { %v2576_v10 = vpop.eup %2575  ;;  %2593 = vrcp.f32 %v1040_v18  ;;  %v1041_v11 = vadd.f32 1.0, %v2574_v8  ;;  %2343 = vmatmul.mubr.bf16.gmra.mrb[32].mxu0 %v1119_v3 }
 0x20f   : > { %v2578_v12 = vpop.eup %2577  ;;  %2595 = vrcp.f32 %v1038_v9  ;;  %v1039_v13 = vadd.f32 1.0, %v2576_v10 }
 0x210   : > { %v2580_v25 = vpop.eup %2579  ;;  %2597 = vrcp.f32 %v1041_v11 }
 0x211   : > { %v2582_v1 = vpop.eup %2581  ;;  %2599 = vrcp.f32 %v1039_v13 }
 0x212   : > { %v2584_v4 = vpop.eup %2583  ;;  %v1121_v14 = vpack.c.bf16 %v2582_v1, %v2578_v12 }
 0x213   : > { %v2586_v15 = vpop.eup %2585  ;;  %v1120_v16 = vpack.c.bf16 %v2584_v4, %v2580_v25 }
 0x214   : > { %v2588_v17 = vpop.eup %2587  ;;  %v1044_v19 = vadd.f32 1.0, %v2586_v15 }
 0x215   : > { %v2590_v20 = vpop.eup %2589  ;;  %v1042_v21 = vadd.f32 1.0, %v2588_v17  ;;  %2346 = vmatprep.mubr.bf16.mxu0 %v1120_v16 }
 0x216   : > { %v2592_v22 = vpop.eup %2591  ;;  %2601 = vrcp.f32 %v1044_v19  ;;  %v1045_v23 = vadd.f32 1.0, %v2590_v20  ;;  %2347 = vmatmul.mubr.bf16.gmra.mrb[36].mxu0 %v1121_v14 }
 0x217   : > { %2603 = vrcp.f32 %v1042_v21  ;;  %v1043_v24 = vadd.f32 1.0, %v2592_v22 }
 0x218   : > { %v2594_v26 = vpop.eup %2593  ;;  %2605 = vrcp.f32 %v1045_v23 }
 0x219   : > { %v2596_v27 = vpop.eup %2595  ;;  %2607 = vrcp.f32 %v1043_v24 }
 0x21a   : > { %v2598_v28 = vpop.eup %2597 }
 0x21b   : > { %v2600_v29 = vpop.eup %2599  ;;  %v1123_v30 = vpack.c.bf16 %v2598_v28, %v2594_v26 }
 0x21c   : > { %v1122_v31 = vpack.c.bf16 %v2600_v29, %v2596_v27 }
 0x21e   : > { %2350 = vmatprep.mubr.bf16.mxu0 %v1122_v31 }
 0x21f   : > { %2351 = vmatmul.mubr.bf16.gmra.mrb[40].mxu0 %v1123_v30 }
 0x220   : > { %v2602_v32 = vpop.eup %2601 }
 0x221   : > { %v2604_v33 = vpop.eup %2603 }
 0x222   : > { %v2606_v34 = vpop.eup %2605 }
 0x223   : > { %v2608_v35 = vpop.eup %2607  ;;  %v1125_v36 = vpack.c.bf16 %v2606_v34, %v2602_v32 }
 0x224   : > { %v1124_v37 = vpack.c.bf16 %v2608_v35, %v2604_v33 }
 0x226   : > { %2354 = vmatprep.mubr.bf16.mxu0 %v1124_v37 }
 0x227   : > { %2355 = vmatmul.mubr.bf16.gmra.mrb[44].mxu0 %v1125_v36 }
 0x2bf   : > { %v2328_v41 = vpop.f32.mrb[16].mxu0 }
 0x2c0   : > { %v1240_v42 = vadd.f32 %v2328_v41, %v3072_v40  ;;  %v1231_v43 = vpop.f32.mrb[17].mxu0 }
 0x2c1   : > { %v1232_v44 = vadd.f32 %v3072_v40, %v1231_v43  ;;  %v2329_v45 = vpop.f32.mrb[18].mxu0 }
 0x2c2   : > { %v1243_v46 = vadd.f32 %v2329_v45, %v3072_v40  ;;  %v1234_v47 = vpop.f32.mrb[19].mxu0  ;;  %v3080_v48 = vsel %vm1360_vm1, %v1240_v42, -inf }
 0x2c3   : > { %v1235_v49 = vadd.f32 %v3072_v40, %v1234_v47  ;;  %1397 = vmax.xlane.f32.xlu1 %v3080_v48  ;;  %v3086_v50 = vsel %vm1360_vm1, %v1232_v44, -inf }
 0x2c4   : > { %1393 = vmax.xlane.f32.xlu0 %v3086_v50  ;;  %v3091_v51 = vsel %vm1360_vm1, %v1243_v46, -inf }
 0x2c5   : > { %v3096_v53 = vsel %vm1360_vm1, %v1235_v49, -inf }
 0x2c7   : > { %1399 = vmax.xlane.f32.xlu1 %v3091_v51  ;;  %v2332_v52 = vpop.f32.mrb[20].mxu0 }
 0x2c8   : > { %v1256_v54 = vadd.f32 %v2332_v52, %v3072_v40  ;;  %v1247_v55 = vpop.f32.mrb[21].mxu0  ;;  %1395 = vmax.xlane.f32.xlu0 %v3096_v53 }
 0x2c9   : > { %v2333_v56 = vpop.f32.mrb[22].mxu0  ;;  %v1248_v60 = vadd.f32 %v3072_v40, %v1247_v55 }
 0x2ca   : > { %v1259_v57 = vadd.f32 %v2333_v56, %v3072_v40  ;;  %v1250_v58 = vpop.f32.mrb[23].mxu0  ;;  %v3103_v59 = vsel %vm1360_vm1, %v1256_v54, -inf }
 0x2cb   : > { %v1251_v61 = vadd.f32 %v3072_v40, %v1250_v58  ;;  %v3115_v63 = vsel %vm1360_vm1, %v1248_v60, -inf }
 0x2cc   : > { %1405 = vmax.xlane.f32.xlu0 %v3103_v59  ;;  %v3110_v62 = vsel %vm1360_vm1, %v1259_v57, -inf }
 0x2cd   : > { %1407 = vmax.xlane.f32.xlu1 %v3110_v62  ;;  %v3120_v2 = vsel %vm1360_vm1, %v1251_v61, -inf }
 0x2d0   : > { %v2336_v0 = vpop.f32.mrb[24].mxu0  ;;  %1401 = vmax.xlane.f32.xlu0 %v3115_v63 }
 0x2d1   : > { %v1272_v3 = vadd.f32 %v2336_v0, %v3072_v40  ;;  %v1263_v5 = vpop.f32.mrb[25].mxu0  ;;  %1403 = vmax.xlane.f32.xlu1 %v3120_v2 }
 0x2d2   : > { %v2337_v6 = vpop.f32.mrb[26].mxu0  ;;  %v1264_v7 = vadd.f32 %v3072_v40, %v1263_v5 }
 0x2d3   : > { %v1275_v18 = vadd.f32 %v2337_v6, %v3072_v40  ;;  %v1266_v8 = vpop.f32.mrb[27].mxu0  ;;  %v3128_v9 = vsel %vm1360_vm1, %v1272_v3, -inf }
 0x2d4   : > { %1413 = vmax.xlane.f32.xlu0 %v3128_v9  ;;  %v1267_v10 = vadd.f32 %v3072_v40, %v1266_v8  ;;  %v3139_v12 = vsel %vm1360_vm1, %v1264_v7, -inf }
 0x2d5   : > { %v3134_v11 = vsel %vm1360_vm1, %v1275_v18, -inf }
 0x2d6   : > { %1415 = vmax.xlane.f32.xlu1 %v3134_v11  ;;  %v3145_v4 = vsel %vm1360_vm1, %v1267_v10, -inf }
 0x2d8   : > { %v2340_v13 = vpop.f32.mrb[28].mxu0  ;;  %1409 = vmax.xlane.f32.xlu0 %v3139_v12 }
 0x2d9   : > { %v1288_v25 = vadd.f32 %v2340_v13, %v3072_v40  ;;  %v1279_v1 = vpop.f32.mrb[29].mxu0 }
 0x2da   : > { %v2341_v14 = vpop.f32.mrb[30].mxu0  ;;  %1411 = vmax.xlane.f32.xlu1 %v3145_v4  ;;  %v1280_v15 = vadd.f32 %v3072_v40, %v1279_v1 }
 0x2db   : > { %v1291_v16 = vadd.f32 %v2341_v14, %v3072_v40  ;;  %v1282_v17 = vpop.f32.mrb[31].mxu0  ;;  %v3152_v19 = vsel %vm1360_vm1, %v1288_v25, -inf }
 0x2dc   : > { %1421 = vmax.xlane.f32.xlu0 %v3152_v19  ;;  %v1283_v20 = vadd.f32 %v3072_v40, %v1282_v17  ;;  %v3163_v22 = vsel %vm1360_vm1, %v1280_v15, -inf }
 0x2dd   : > { %v3158_v21 = vsel %vm1360_vm1, %v1291_v16, -inf }
 0x2de   : > { %1423 = vmax.xlane.f32.xlu1 %v3158_v21  ;;  %v3168_v24 = vsel %vm1360_vm1, %v1283_v20, -inf }
 0x2e0   : > { %1417 = vmax.xlane.f32.xlu0 %v3163_v22 }
 0x2e1   : > { %v2344_v23 = vpop.f32.mrb[32].mxu0 }
 0x2e2   : > { %v1304_v26 = vadd.f32 %v2344_v23, %v3072_v40  ;;  %v1295_v27 = vpop.f32.mrb[33].mxu0  ;;  %1419 = vmax.xlane.f32.xlu1 %v3168_v24 }
 0x2e3   : > { %v2345_v28 = vpop.f32.mrb[34].mxu0  ;;  %v1296_v29 = vadd.f32 %v3072_v40, %v1295_v27 }
 0x2e4   : > { %v1307_v30 = vadd.f32 %v2345_v28, %v3072_v40  ;;  %v1298_v31 = vpop.f32.mrb[35].mxu0  ;;  %v3176_v32 = vsel %vm1360_vm1, %v1304_v26, -inf }
 0x2e5   : > { %1429 = vmax.xlane.f32.xlu0 %v3176_v32  ;;  %v1299_v33 = vadd.f32 %v3072_v40, %v1298_v31  ;;  %v3187_v35 = vsel %vm1360_vm1, %v1296_v29, -inf }
 0x2e6   : > { %v3182_v34 = vsel %vm1360_vm1, %v1307_v30, -inf }
 0x2e7   : > { %1431 = vmax.xlane.f32.xlu1 %v3182_v34  ;;  %v3193_v41 = vsel %vm1360_vm1, %v1299_v33, -inf }
 0x2e9   : > { %v2348_v36 = vpop.f32.mrb[36].mxu0  ;;  %1425 = vmax.xlane.f32.xlu0 %v3187_v35 }
 0x2ea   : > { %v1320_v37 = vadd.f32 %v2348_v36, %v3072_v40  ;;  %v1311_v38 = vpop.f32.mrb[37].mxu0 }
 0x2eb   : > { %v2349_v42 = vpop.f32.mrb[38].mxu0  ;;  %1427 = vmax.xlane.f32.xlu1 %v3193_v41  ;;  %v1312_v43 = vadd.f32 %v3072_v40, %v1311_v38 }
 0x2ec   : > { %v1323_v44 = vadd.f32 %v2349_v42, %v3072_v40  ;;  %v1314_v45 = vpop.f32.mrb[39].mxu0  ;;  %v3200_v46 = vsel %vm1360_vm1, %v1320_v37, -inf }
 0x2ed   : > { %1437 = vmax.xlane.f32.xlu0 %v3200_v46  ;;  %v1315_v47 = vadd.f32 %v3072_v40, %v1314_v45  ;;  %v3211_v52 = vsel %vm1360_vm1, %v1312_v43, -inf }
 0x2ee   : > { %v3206_v49 = vsel %vm1360_vm1, %v1323_v44, -inf }
 0x2ef   : > { %1439 = vmax.xlane.f32.xlu1 %v3206_v49  ;;  %v3216_v55 = vsel %vm1360_vm1, %v1315_v47, -inf }
 0x2f1   : > { %1433 = vmax.xlane.f32.xlu0 %v3211_v52 }
 0x2f2   : > { %v2352_v54 = vpop.f32.mrb[40].mxu0 }
 0x2f3   : > { %v1336_v56 = vadd.f32 %v2352_v54, %v3072_v40  ;;  %v1327_v57 = vpop.f32.mrb[41].mxu0  ;;  %1435 = vmax.xlane.f32.xlu1 %v3216_v55 }
 0x2f4   : > { %v2353_v58 = vpop.f32.mrb[42].mxu0  ;;  %v1328_v60 = vadd.f32 %v3072_v40, %v1327_v57 }
 0x2f5   : > { %v1339_v61 = vadd.f32 %v2353_v58, %v3072_v40  ;;  %v1330_v0 = vpop.f32.mrb[43].mxu0  ;;  %v3224_v3 = vsel %vm1360_vm1, %v1336_v56, -inf }
 0x2f6   : > { %1445 = vmax.xlane.f32.xlu0 %v3224_v3  ;;  %v1331_v5 = vadd.f32 %v3072_v40, %v1330_v0  ;;  %v3235_v7 = vsel %vm1360_vm1, %v1328_v60, -inf }
 0x2f7   : > { %v3230_v6 = vsel %vm1360_vm1, %v1339_v61, -inf }
 0x2f8   : > { %1447 = vmax.xlane.f32.xlu1 %v3230_v6  ;;  %v3241_v13 = vsel %vm1360_vm1, %v1331_v5, -inf }
 0x2fa   : > { %v2356_v18 = vpop.f32.mrb[44].mxu0  ;;  %1441 = vmax.xlane.f32.xlu0 %v3235_v7 }
 0x2fb   : > { %v1352_v8 = vadd.f32 %v2356_v18, %v3072_v40  ;;  %v1343_v10 = vpop.f32.mrb[45].mxu0 }
 0x2fc   : > { %v1344_v25 = vadd.f32 %v3072_v40, %v1343_v10  ;;  %v2357_v1 = vpop.f32.mrb[46].mxu0  ;;  %1443 = vmax.xlane.f32.xlu1 %v3241_v13 }
 0x2fd   : > { %v1355_v14 = vadd.f32 %v2357_v1, %v3072_v40  ;;  %v1346_v15 = vpop.f32.mrb[47].mxu0  ;;  %v3248_v16 = vsel %vm1360_vm1, %v1352_v8, -inf }
 0x2fe   : > { %v1347_v17 = vadd.f32 %v3072_v40, %v1346_v15  ;;  %v3253_v20 = vsel %vm1360_vm1, %v1344_v25, -inf }
 0x2ff   : > { %1449 = vmax.xlane.f32.xlu0 %v3253_v20  ;;  %v3258_v23 = vsel %vm1360_vm1, %v1355_v14, -inf }
 0x300   : > { %v3262_v26 = vsel %vm1360_vm1, %v1347_v17, -inf }
 0x301   : > { %1451 = vmax.xlane.f32.xlu1 %v3262_v26 }
 0x303   : > { %1453 = vmax.xlane.f32.xlu0 %v3248_v16 }
 0x305   : > { %1455 = vmax.xlane.f32.xlu1 %v3258_v23 }
 0x350   : > { %v1398_v40 = vpop.xlane.xlu1 %1397 }
 0x351   : > { %v1459_v27 = vsub.f32 %v3080_v48, %v1398_v40  ;;  %v1394_v28 = vpop.xlane.xlu0 %1393 }
 0x352   : > { %v1457_v29 = vsub.f32 %v3086_v50, %v1394_v28 }
 0x353   : > { %v1493_v30 = vmul.f32 1.442695, %v1459_v27 }
 0x354   : > { %v1489_v31 = vmul.f32 1.442695, %v1457_v29  ;;  %v1400_v33 = vpop.xlane.xlu1 %1399 }
 0x355   : > { %2609 = vpow2.f32 %v1493_v30  ;;  %v1460_v39 = vsub.f32 %v3091_v51, %v1400_v33  ;;  %v1396_v36 = vpop.xlane.xlu0 %1395 }
 0x356   : > { %v1458_v37 = vsub.f32 %v3096_v53, %v1396_v36  ;;  %2611 = vpow2.f32 %v1489_v31 }
 0x357   : > { %v1495_v38 = vmul.f32 1.442695, %v1460_v39 }
 0x358   : > { %v1491_v42 = vmul.f32 1.442695, %v1458_v37 }
 0x359   : > { %2613 = vpow2.f32 %v1495_v38  ;;  %v1406_v43 = vpop.xlane.xlu0 %1405 }
 0x35a   : > { %v1463_v44 = vsub.f32 %v3103_v59, %v1406_v43  ;;  %v1408_v48 = vpop.xlane.xlu1 %1407  ;;  %2615 = vpow2.f32 %v1491_v42 }
 0x35b   : > { %v1464_v45 = vsub.f32 %v3110_v62, %v1408_v48 }
 0x35c   : > { %v1501_v50 = vmul.f32 1.442695, %v1463_v44 }
 0x35d   : > { %v1503_v47 = vmul.f32 1.442695, %v1464_v45  ;;  %v1402_v54 = vpop.xlane.xlu0 %1401 }
 0x35e   : > { %2617 = vpow2.f32 %v1501_v50  ;;  %v1461_v51 = vsub.f32 %v3115_v63, %v1402_v54  ;;  %v1404_v56 = vpop.xlane.xlu1 %1403 }
 0x35f   : > { %v3274_v57 = vpop.eup %2609  ;;  %v1462_v53 = vsub.f32 %v3120_v2, %v1404_v56  ;;  %2619 = vpow2.f32 %v1503_v47 }
 0x360   : > { %v1497_v58 = vmul.f32 1.442695, %v1461_v51  ;;  %1557 = vadd.xlane.f32.xlu0 %v3274_v57  ;;  %v3278_v61 = vpop.eup %2611 }
 0x361   : > { %v1499_v59 = vmul.f32 1.442695, %v1462_v53  ;;  %v1414_v60 = vpop.xlane.xlu0 %1413 }
 0x362   : > { %2621 = vpow2.f32 %v1497_v58  ;;  %v1467_v62 = vsub.f32 %v3128_v9, %v1414_v60 }
 0x363   : > { %v3281_v0 = vpop.eup %2613  ;;  %v1416_v5 = vpop.xlane.xlu1 %1415  ;;  %2623 = vpow2.f32 %v1499_v59 }
 0x364   : > { %v1509_v63 = vmul.f32 1.442695, %v1467_v62  ;;  %v1468_v18 = vsub.f32 %v3134_v11, %v1416_v5  ;;  %1559 = vadd.xlane.f32.xlu1 %v3281_v0  ;;  %1553 = vadd.xlane.f32.xlu0 %v3278_v61  ;;  %v3287_v25 = vpop.eup %2615 }
 0x365   : > { %v1410_v2 = vpop.xlane.xlu0 %1409 }
 0x366   : > { %2625 = vpow2.f32 %v1509_v63  ;;  %v1511_v8 = vmul.f32 1.442695, %v1468_v18  ;;  %v1465_v10 = vsub.f32 %v3139_v12, %v1410_v2 }
 0x367   : > { %v1412_v1 = vpop.xlane.xlu1 %1411 }
 0x368   : > { %v3289_v9 = vpop.eup %2617  ;;  %v1505_v14 = vmul.f32 1.442695, %v1465_v10  ;;  %v1466_v15 = vsub.f32 %v3145_v4, %v1412_v1  ;;  %1555 = vadd.xlane.f32.xlu1 %v3287_v25  ;;  %2627 = vpow2.f32 %v1511_v8 }
 0x369   : > { %1565 = vadd.xlane.f32.xlu0 %v3289_v9  ;;  %v1422_v11 = vpop.xlane.xlu0 %1421  ;;  %v3295_v27 = vpop.eup %2619 }
 0x36a   : > { %2629 = vpow2.f32 %v1505_v14  ;;  %v1507_v17 = vmul.f32 1.442695, %v1466_v15  ;;  %v1471_v40 = vsub.f32 %v3152_v19, %v1422_v11 }
 0x36b   : > { %v1424_v12 = vpop.xlane.xlu1 %1423 }
 0x36c   : > { %v3297_v28 = vpop.eup %2621  ;;  %v1517_v29 = vmul.f32 1.442695, %v1471_v40  ;;  %v1472_v30 = vsub.f32 %v3158_v21, %v1424_v12  ;;  %1567 = vadd.xlane.f32.xlu1 %v3295_v27  ;;  %2631 = vpow2.f32 %v1507_v17 }
 0x36d   : > { %1561 = vadd.xlane.f32.xlu0 %v3297_v28  ;;  %v1418_v4 = vpop.xlane.xlu0 %1417  ;;  %v3303_v39 = vpop.eup %2623 }
 0x36e   : > { %2633 = vpow2.f32 %v1517_v29  ;;  %v1519_v31 = vmul.f32 1.442695, %v1472_v30  ;;  %v1469_v33 = vsub.f32 %v3163_v22, %v1418_v4 }
 0x36f   : > { %v1420_v19 = vpop.xlane.xlu1 %1419 }
 0x370   : > { %v3305_v36 = vpop.eup %2625  ;;  %v1513_v37 = vmul.f32 1.442695, %v1469_v33  ;;  %v1470_v38 = vsub.f32 %v3168_v24, %v1420_v19  ;;  %1563 = vadd.xlane.f32.xlu1 %v3303_v39  ;;  %2635 = vpow2.f32 %v1519_v31 }
 0x371   : > { %1573 = vadd.xlane.f32.xlu0 %v3305_v36 }
 0x372   : > { %2637 = vpow2.f32 %v1513_v37  ;;  %v1515_v21 = vmul.f32 1.442695, %v1470_v38  ;;  %v1430_v42 = vpop.xlane.xlu0 %1429  ;;  %v3310_v43 = vpop.eup %2627 }
 0x373   : > { %v1475_v22 = vsub.f32 %v3176_v32, %v1430_v42 }
 0x374   : > { %v3313_v44 = vpop.eup %2629  ;;  %v1432_v48 = vpop.xlane.xlu1 %1431  ;;  %1575 = vadd.xlane.f32.xlu1 %v3310_v43  ;;  %2639 = vpow2.f32 %v1515_v21 }
 0x375   : > { %v1525_v45 = vmul.f32 1.442695, %v1475_v22  ;;  %v1476_v24 = vsub.f32 %v3182_v34, %v1432_v48  ;;  %1569 = vadd.xlane.f32.xlu0 %v3313_v44 }
 0x376   : > { %v1426_v50 = vpop.xlane.xlu0 %1425  ;;  %v3318_v47 = vpop.eup %2631 }
 0x377   : > { %2641 = vpow2.f32 %v1525_v45  ;;  %v1527_v54 = vmul.f32 1.442695, %v1476_v24  ;;  %v1473_v51 = vsub.f32 %v3187_v35, %v1426_v50 }
 0x378   : > { %v3321_v56 = vpop.eup %2633  ;;  %v1428_v32 = vpop.xlane.xlu1 %1427  ;;  %1571 = vadd.xlane.f32.xlu1 %v3318_v47 }
 0x379   : > { %2643 = vpow2.f32 %v1527_v54  ;;  %v1521_v53 = vmul.f32 1.442695, %v1473_v51  ;;  %v1474_v58 = vsub.f32 %v3193_v41, %v1428_v32  ;;  %1581 = vadd.xlane.f32.xlu0 %v3321_v56 }
 0x37a   : > { %v1438_v34 = vpop.xlane.xlu0 %1437  ;;  %v3326_v59 = vpop.eup %2635 }
 0x37b   : > { %2645 = vpow2.f32 %v1521_v53  ;;  %v1523_v60 = vmul.f32 1.442695, %v1474_v58  ;;  %v1479_v62 = vsub.f32 %v3200_v46, %v1438_v34 }
 0x37c   : > { %v3329_v5 = vpop.eup %2637  ;;  %v1440_v35 = vpop.xlane.xlu1 %1439  ;;  %1583 = vadd.xlane.f32.xlu1 %v3326_v59 }
 0x37d   : > { %2647 = vpow2.f32 %v1523_v60  ;;  %v1533_v63 = vmul.f32 1.442695, %v1479_v62  ;;  %v1480_v18 = vsub.f32 %v3206_v49, %v1440_v35  ;;  %1577 = vadd.xlane.f32.xlu0 %v3329_v5 }
 0x37e   : > { %v1434_v41 = vpop.xlane.xlu0 %1433  ;;  %v3334_v2 = vpop.eup %2639 }
 0x37f   : > { %2649 = vpow2.f32 %v1533_v63  ;;  %v1535_v8 = vmul.f32 1.442695, %v1480_v18  ;;  %v1477_v10 = vsub.f32 %v3211_v52, %v1434_v41 }
 0x380   : > { %v1436_v1 = vpop.xlane.xlu1 %1435  ;;  %1579 = vadd.xlane.f32.xlu1 %v3334_v2 }
 0x381   : > { %v3338_v46 = vpop.eup %2641  ;;  %2651 = vpow2.f32 %v1535_v8  ;;  %v1529_v14 = vmul.f32 1.442695, %v1477_v10  ;;  %v1478_v15 = vsub.f32 %v3216_v55, %v1436_v1 }
 0x382   : > { %1589 = vadd.xlane.f32.xlu0 %v3338_v46 }
 0x383   : > { %v3342_v49 = vpop.eup %2643  ;;  %2653 = vpow2.f32 %v1529_v14  ;;  %v1531_v11 = vmul.f32 1.442695, %v1478_v15  ;;  %v1446_v17 = vpop.xlane.xlu0 %1445 }
 0x384   : > { %v1483_v40 = vsub.f32 %v3224_v3, %v1446_v17  ;;  %1591 = vadd.xlane.f32.xlu1 %v3342_v49 }
 0x385   : > { %v3346_v52 = vpop.eup %2645  ;;  %2655 = vpow2.f32 %v1531_v11  ;;  %v1448_v12 = vpop.xlane.xlu1 %1447 }
 0x386   : > { %v1541_v29 = vmul.f32 1.442695, %v1483_v40  ;;  %v1484_v30 = vsub.f32 %v3230_v6, %v1448_v12  ;;  %1585 = vadd.xlane.f32.xlu0 %v3346_v52 }
 0x387   : > { %v3350_v55 = vpop.eup %2647  ;;  %v1442_v4 = vpop.xlane.xlu0 %1441 }
 0x388   : > { %2657 = vpow2.f32 %v1541_v29  ;;  %v1543_v31 = vmul.f32 1.442695, %v1484_v30  ;;  %v1481_v33 = vsub.f32 %v3235_v7, %v1442_v4  ;;  %1587 = vadd.xlane.f32.xlu1 %v3350_v55 }
 0x389   : > { %v3354_v3 = vpop.eup %2649  ;;  %v1444_v19 = vpop.xlane.xlu1 %1443 }
 0x38a   : > { %2659 = vpow2.f32 %v1543_v31  ;;  %v1537_v37 = vmul.f32 1.442695, %v1481_v33  ;;  %v1482_v38 = vsub.f32 %v3241_v13, %v1444_v19  ;;  %1597 = vadd.xlane.f32.xlu0 %v3354_v3 }
 0x38b   : > { %v3358_v6 = vpop.eup %2651 }
 0x38c   : > { %2661 = vpow2.f32 %v1537_v37  ;;  %v1539_v21 = vmul.f32 1.442695, %v1482_v38  ;;  %v1450_v42 = vpop.xlane.xlu0 %1449  ;;  %1599 = vadd.xlane.f32.xlu1 %v3358_v6 }
 0x38d   : > { %v3361_v22 = vpop.eup %2653  ;;  %v1485_v7 = vsub.f32 %v3253_v20, %v1450_v42 }
 0x38e   : > { %2663 = vpow2.f32 %v1539_v21  ;;  %v1452_v48 = vpop.xlane.xlu1 %1451  ;;  %1593 = vadd.xlane.f32.xlu0 %v3361_v22 }
 0x38f   : > { %v3365_v45 = vpop.eup %2655  ;;  %v1545_v13 = vmul.f32 1.442695, %v1485_v7  ;;  %v1486_v24 = vsub.f32 %v3262_v26, %v1452_v48 }
 0x390   : > { %v1454_v50 = vpop.xlane.xlu0 %1453  ;;  %1595 = vadd.xlane.f32.xlu1 %v3365_v45 }
 0x391   : > { %2665 = vpow2.f32 %v1545_v13  ;;  %v1547_v54 = vmul.f32 1.442695, %v1486_v24  ;;  %v1487_v51 = vsub.f32 %v3248_v16, %v1454_v50 }
 0x392   : > { %v3370_v32 = vpop.eup %2657  ;;  %v1456_v53 = vpop.xlane.xlu1 %1455 }
 0x393   : > { %2667 = vpow2.f32 %v1547_v54  ;;  %v1549_v20 = vmul.f32 1.442695, %v1487_v51  ;;  %v1488_v58 = vsub.f32 %v3258_v23, %v1456_v53  ;;  %1605 = vadd.xlane.f32.xlu0 %v3370_v32 }
 0x394   : > { %v3374_v34 = vpop.eup %2659 }
 0x395   : > { %2669 = vpow2.f32 %v1549_v20  ;;  %v1551_v26 = vmul.f32 1.442695, %v1488_v58  ;;  %1607 = vadd.xlane.f32.xlu1 %v3374_v34 }
 0x396   : > { %v3377_v60 = vpop.eup %2661 }
 0x397   : > { %2671 = vpow2.f32 %v1551_v26  ;;  %1601 = vadd.xlane.f32.xlu0 %v3377_v60 }
 0x398   : > { %v3380_v16 = vpop.eup %2663 }
 0x399   : > { %1603 = vadd.xlane.f32.xlu1 %v3380_v16 }
 0x39b   : > { %v3383_v62 = vpop.eup %2665 }
 0x39c   : > { %1609 = vadd.xlane.f32.xlu0 %v3383_v62 }
 0x39d   : > { %v3386_v23 = vpop.eup %2667 }
 0x39e   : > { %1611 = vadd.xlane.f32.xlu1 %v3386_v23 }
 0x39f   : > { %v3389_v35 = vpop.eup %2669 }
 0x3a0   : > { %1613 = vadd.xlane.f32.xlu0 %v3389_v35 }
 0x3a1   : > { %v3392_v63 = vpop.eup %2671 }
 0x3a2   : > { %1615 = vadd.xlane.f32.xlu1 %v3392_v63 }
 0x3ed   : > { %v1558_v18 = vpop.xlane.xlu0 %1557 }
 0x3ee   : > { %2673 = vrcp.f32 %v1558_v18 }
 0x3f1   : > { %v1560_v41 = vpop.xlane.xlu1 %1559  ;;  %v1554_v8 = vpop.xlane.xlu0 %1553 }
 0x3f2   : > { %2675 = vrcp.f32 %v1560_v41 }
 0x3f3   : > { %2677 = vrcp.f32 %v1554_v8 }
 0x3f5   : > { %v1556_v10 = vpop.xlane.xlu1 %1555 }
 0x3f6   : > { %2679 = vrcp.f32 %v1556_v10  ;;  %v1566_v1 = vpop.xlane.xlu0 %1565 }
 0x3f7   : > { %2681 = vrcp.f32 %v1566_v1 }
 0x3f8   : > { %v2674_v14 = vpop.eup %2673 }
 0x3f9   : > { %v1651_v15 = vmul.f32 %v2674_v14, %v3274_v57  ;;  %v1568_v11 = vpop.xlane.xlu1 %1567 }
 0x3fa   : > { %2683 = vrcp.f32 %v1568_v11  ;;  %v1562_v17 = vpop.xlane.xlu0 %1561 }
 0x3fb   : > { %1683 = vst [vmem:[%s3397_s30 + $0x10] sm:$0xff] %v1651_v15  ;;  %2685 = vrcp.f32 %v1562_v17 }
 0x3fc   : > { %v2676_v40 = vpop.eup %2675 }
 0x3fd   : > { %v2678_v12 = vpop.eup %2677  ;;  %v1652_v29 = vmul.f32 %v2676_v40, %v3281_v0  ;;  %v1564_v30 = vpop.xlane.xlu1 %1563 }
 0x3fe   : > { %v1649_v4 = vmul.f32 %v2678_v12, %v3278_v61  ;;  %2687 = vrcp.f32 %v1564_v30  ;;  %v1574_v57 = vpop.xlane.xlu0 %1573 }
 0x3ff   : > { %1684 = vst [vmem:[%s3397_s30 + $0x18] sm:$0xff] %v1652_v29  ;;  %2689 = vrcp.f32 %v1574_v57 }
 0x400   : > { %v2680_v31 = vpop.eup %2679  ;;  %1681 = vst [vmem:[%s3397_s30] sm:$0xff] %v1649_v4 }
 0x401   : > { %v2682_v33 = vpop.eup %2681  ;;  %v1650_v19 = vmul.f32 %v2680_v31, %v3287_v25  ;;  %v1576_v37 = vpop.xlane.xlu1 %1575 }
 0x402   : > { %v1655_v38 = vmul.f32 %v2682_v33, %v3289_v9  ;;  %2691 = vrcp.f32 %v1576_v37  ;;  %v1570_v0 = vpop.xlane.xlu0 %1569 }
 0x403   : > { %1682 = vst [vmem:[%s3397_s30 + $0x8] sm:$0xff] %v1650_v19  ;;  %2693 = vrcp.f32 %v1570_v0 }
 0x404   : > { %v2684_v61 = vpop.eup %2683  ;;  %1687 = vst [vmem:[%s3397_s30 + $0x30] sm:$0xff] %v1655_v38 }
 0x405   : > { %v2686_v21 = vpop.eup %2685  ;;  %v1656_v42 = vmul.f32 %v2684_v61, %v3295_v27  ;;  %v1572_v7 = vpop.xlane.xlu1 %1571 }
 0x406   : > { %v1653_v48 = vmul.f32 %v2686_v21, %v3297_v28  ;;  %2695 = vrcp.f32 %v1572_v7  ;;  %v1582_v25 = vpop.xlane.xlu0 %1581 }
 0x407   : > { %1688 = vst [vmem:[%s3397_s30 + $0x38] sm:$0xff] %v1656_v42  ;;  %2697 = vrcp.f32 %v1582_v25 }
 0x408   : > { %v2688_v9 = vpop.eup %2687  ;;  %1685 = vst [vmem:[%s3397_s30 + $0x20] sm:$0xff] %v1653_v48 }
 0x409   : > { %v2690_v13 = vpop.eup %2689  ;;  %v1654_v24 = vmul.f32 %v2688_v9, %v3303_v39  ;;  %v1584_v50 = vpop.xlane.xlu1 %1583 }
 0x40a   : > { %v1659_v54 = vmul.f32 %v2690_v13, %v3305_v36  ;;  %2699 = vrcp.f32 %v1584_v50  ;;  %v1578_v27 = vpop.xlane.xlu0 %1577 }
 0x40b   : > { %1686 = vst [vmem:[%s3397_s30 + $0x28] sm:$0xff] %v1654_v24  ;;  %2701 = vrcp.f32 %v1578_v27 }
 0x40c   : > { %v2692_v28 = vpop.eup %2691  ;;  %1691 = vst [vmem:[%s3397_s30 + $0x50] sm:$0xff] %v1659_v54 }
 0x40d   : > { %v2694_v51 = vpop.eup %2693  ;;  %v1660_v53 = vmul.f32 %v2692_v28, %v3310_v43  ;;  %v1580_v20 = vpop.xlane.xlu1 %1579 }
 0x40e   : > { %v1657_v58 = vmul.f32 %v2694_v51, %v3313_v44  ;;  %2703 = vrcp.f32 %v1580_v20 }
 0x40f   : > { %1692 = vst [vmem:[%s3397_s30 + $0x58] sm:$0xff] %v1660_v53  ;;  %v1590_v39 = vpop.xlane.xlu0 %1589 }
 0x410   : > { %v2696_v26 = vpop.eup %2695  ;;  %1689 = vst [vmem:[%s3397_s30 + $0x40] sm:$0xff] %v1657_v58  ;;  %2705 = vrcp.f32 %v1590_v39 }
 0x411   : > { %v2698_v36 = vpop.eup %2697  ;;  %v1658_v18 = vmul.f32 %v2696_v26, %v3318_v47  ;;  %v1592_v41 = vpop.xlane.xlu1 %1591 }
 0x412   : > { %v1663_v8 = vmul.f32 %v2698_v36, %v3321_v56  ;;  %2707 = vrcp.f32 %v1592_v41 }
 0x413   : > { %1690 = vst [vmem:[%s3397_s30 + $0x48] sm:$0xff] %v1658_v18  ;;  %v1586_v43 = vpop.xlane.xlu0 %1585 }
 0x414   : > { %v2700_v10 = vpop.eup %2699  ;;  %1695 = vst [vmem:[%s3397_s30 + $0x70] sm:$0xff] %v1663_v8  ;;  %2709 = vrcp.f32 %v1586_v43 }
 0x415   : > { %v2702_v44 = vpop.eup %2701  ;;  %v1664_v1 = vmul.f32 %v2700_v10, %v3326_v59  ;;  %v1588_v14 = vpop.xlane.xlu1 %1587 }
 0x416   : > { %v1661_v15 = vmul.f32 %v2702_v44, %v3329_v5  ;;  %2711 = vrcp.f32 %v1588_v14 }
 0x417   : > { %1696 = vst [vmem:[%s3397_s30 + $0x78] sm:$0xff] %v1664_v1  ;;  %v1598_v47 = vpop.xlane.xlu0 %1597 }
 0x418   : > { %v2704_v11 = vpop.eup %2703  ;;  %1693 = vst [vmem:[%s3397_s30 + $0x60] sm:$0xff] %v1661_v15  ;;  %2713 = vrcp.f32 %v1598_v47 }
 0x419   : > { %v1662_v56 = vmul.f32 %v2704_v11, %v3334_v2  ;;  %v1600_v17 = vpop.xlane.xlu1 %1599 }
 0x41a   : > { %v2706_v40 = vpop.eup %2705  ;;  %2715 = vrcp.f32 %v1600_v17 }
 0x41b   : > { %1694 = vst [vmem:[%s3397_s30 + $0x68] sm:$0xff] %v1662_v56  ;;  %v1667_v59 = vmul.f32 %v2706_v40, %v3338_v46  ;;  %v1594_v12 = vpop.xlane.xlu0 %1593 }
 0x41c   : > { %v2708_v29 = vpop.eup %2707  ;;  %2717 = vrcp.f32 %v1594_v12 }
 0x41d   : > { %1699 = vst [vmem:[%s3397_s30 + $0x90] sm:$0xff] %v1667_v59  ;;  %v1668_v5 = vmul.f32 %v2708_v29, %v3342_v49  ;;  %v1596_v30 = vpop.xlane.xlu1 %1595 }
 0x41e   : > { %v2710_v4 = vpop.eup %2709  ;;  %2719 = vrcp.f32 %v1596_v30 }
 0x41f   : > { %1700 = vst [vmem:[%s3397_s30 + $0x98] sm:$0xff] %v1668_v5  ;;  %v1665_v2 = vmul.f32 %v2710_v4, %v3346_v52 }
 0x420   : > { %v2712_v57 = vpop.eup %2711  ;;  %v1606_v31 = vpop.xlane.xlu0 %1605 }
 0x421   : > { %1697 = vst [vmem:[%s3397_s30 + $0x80] sm:$0xff] %v1665_v2  ;;  %v1666_v46 = vmul.f32 %v2712_v57, %v3350_v55  ;;  %2721 = vrcp.f32 %v1606_v31 }
 0x422   : > { %v2714_v33 = vpop.eup %2713  ;;  %v1608_v19 = vpop.xlane.xlu1 %1607 }
 0x423   : > { %1698 = vst [vmem:[%s3397_s30 + $0x88] sm:$0xff] %v1666_v46  ;;  %v1671_v49 = vmul.f32 %v2714_v33, %v3354_v3  ;;  %2723 = vrcp.f32 %v1608_v19 }
 0x424   : > { %v2716_v37 = vpop.eup %2715  ;;  %v1602_v38 = vpop.xlane.xlu0 %1601 }
 0x425   : > { %1703 = vst [vmem:[%s3397_s30 + $0xb0] sm:$0xff] %v1671_v49  ;;  %v1672_v52 = vmul.f32 %v2716_v37, %v3358_v6  ;;  %2725 = vrcp.f32 %v1602_v38 }
 0x426   : > { %v2718_v0 = vpop.eup %2717  ;;  %v1604_v61 = vpop.xlane.xlu1 %1603 }
 0x427   : > { %1704 = vst [vmem:[%s3397_s30 + $0xb8] sm:$0xff] %v1672_v52  ;;  %v1669_v55 = vmul.f32 %v2718_v0, %v3361_v22  ;;  %2727 = vrcp.f32 %v1604_v61 }
 0x428   : > { %v2720_v21 = vpop.eup %2719 }
 0x429   : > { %1701 = vst [vmem:[%s3397_s30 + $0xa0] sm:$0xff] %v1669_v55  ;;  %v1670_v3 = vmul.f32 %v2720_v21, %v3365_v45  ;;  %v1610_v42 = vpop.xlane.xlu0 %1609 }
 0x42a   : > { %2729 = vrcp.f32 %v1610_v42 }
 0x42b   : > { %v2722_v7 = vpop.eup %2721  ;;  %1702 = vst [vmem:[%s3397_s30 + $0xa8] sm:$0xff] %v1670_v3  ;;  %v1612_v48 = vpop.xlane.xlu1 %1611 }
 0x42c   : > { %v1675_v6 = vmul.f32 %v2722_v7, %v3370_v32  ;;  %2731 = vrcp.f32 %v1612_v48 }
 0x42d   : > { %v2724_v25 = vpop.eup %2723  ;;  %v1614_v9 = vpop.xlane.xlu0 %1613 }
 0x42e   : > { %1707 = vst [vmem:[%s3397_s30 + $0xd0] sm:$0xff] %v1675_v6  ;;  %v1676_v22 = vmul.f32 %v2724_v25, %v3374_v34  ;;  %2733 = vrcp.f32 %v1614_v9 }
 0x42f   : > { %v2726_v13 = vpop.eup %2725  ;;  %v1616_v45 = vpop.xlane.xlu1 %1615 }
 0x430   : > { %1708 = vst [vmem:[%s3397_s30 + $0xd8] sm:$0xff] %v1676_v22  ;;  %v1673_v24 = vmul.f32 %v2726_v13, %v3377_v60  ;;  %2735 = vrcp.f32 %v1616_v45 }
 0x431   : > { %v2728_v50 = vpop.eup %2727 }
 0x432   : > { %1705 = vst [vmem:[%s3397_s30 + $0xc0] sm:$0xff] %v1673_v24  ;;  %v1674_v32 = vmul.f32 %v2728_v50, %v3380_v16 }
 0x434   : > { %v2730_v54 = vpop.eup %2729  ;;  %1706 = vst [vmem:[%s3397_s30 + $0xc8] sm:$0xff] %v1674_v32 }
 0x435   : > { %v1677_v27 = vmul.f32 %v2730_v54, %v3383_v62 }
 0x436   : > { %v2732_v28 = vpop.eup %2731 }
 0x437   : > { %1709 = vst [vmem:[%s3397_s30 + $0xe0] sm:$0xff] %v1677_v27  ;;  %v1678_v34 = vmul.f32 %v2732_v28, %v3386_v23  ;;  %1719 = sbr.rel (!%p2890_p4) target bundleno = 1142 (0x476), region = 52 }
 0x438   : > { %v2734_v51 = vpop.eup %2733 }
 0x439   : > { %1710 = vst [vmem:[%s3397_s30 + $0xe8] sm:$0xff] %v1678_v34  ;;  %v1679_v53 = vmul.f32 %v2734_v51, %v3389_v35 }
 0x43a   : > { %v2736_v20 = vpop.eup %2735 }
 0x43b   : > { %1711 = vst [vmem:[%s3397_s30 + $0xf0] sm:$0xff] %v1679_v53  ;;  %v1680_v60 = vmul.f32 %v2736_v20, %v3392_v63 }
 0x43d   : > { %1712 = vst [vmem:[%s3397_s30 + $0xf8] sm:$0xff] %v1680_v60 }
 0x43e   : > { %s3619_s24 = smov (!%p1722_p8, %s1721_s24), 32 }
 0x43f   : > { %s2145_s15 = sshll.u32 %s3619_s24, 7 }
 0x440   : > { %p2148_p9 = scmp.eq.s32.totalorder %s2145_s15, 0 }
 0x441   : > { %s3475_s16 = sshrl.u32 (!%p2148_p9), %s3619_s24, 5 }
 0x442   : > { %1730 = sbr.rel (%p2148_p9) target bundleno = 1142 (0x476), region = 56  ;;  %p2149_p10 = scmp.le.s32.totalorder (!%p2148_p9), %s3475_s16, 0 }
 0x449   : > { %2008 = sbr.rel (%p2149_p10) target bundleno = 1121 (0x461), region = 132  ;;  %s3610_s27 = smov (!%p2149_p10), %s3469_s14 }
 0x44a   : > { %s3611_s9 = smov (!%p2149_p10), %s3397_s30  ;;  %s3484_s12 = smov (!%p2149_p10), 0  }
 0x44b   : > { %s3486_s17 = smov (!%p2149_p10), 0  }
 0x450 LB: >> { %v1854_v16 = vld [vmem:[%s2799_s9] sm:$0xff]  ;;  %v1856_v62 = vld [vmem:[%s2799_s9 + $0x8] sm:$0xff]  ;;  %v1858_v23 = vld [vmem:[%s2799_s9 + $0x10] sm:$0xff]  ;;  %s1918_s18 = sadd.s32 1, %s2803_s12  ;;  %s1848_s17 = sadd.s32 1, %s2807_s17   ;;  %s2807_s17 = sphi %s3486_s17, %s1848_s17   ;;  %s2803_s12 = sphi %s3484_s12, %s3614_s12   ;;  %s2799_s9 = sphi %s3611_s9, %s3613_s9   ;;  %s2795_s27 = sphi %s3610_s27, %s3612_s27  }
 0x451   : >> { %1855 = vst [vmem:[%s2795_s27] sm:$0xff] %v1854_v16  ;;  %1857 = vst [vmem:[%s2795_s27 + $0x8] sm:$0xff] %v1856_v62  ;;  %v1860_v35 = vld [vmem:[%s2799_s9 + $0x18] sm:$0xff]  ;;  %v1862_v63 = vld [vmem:[%s2799_s9 + $0x20] sm:$0xff]  ;;  %p1919_p11 = scmp.ge.s32.totalorder %s1918_s18, %s3475_s16  ;;  %p1847_p12 = scmp.ge.s32.totalorder %s1848_s17, %s3475_s16 }
 0x452   : >> { %1859 = vst [vmem:[%s2795_s27 + $0x10] sm:$0xff] %v1858_v23  ;;  %v1864_v58 = vld [vmem:[%s2799_s9 + $0x28] sm:$0xff]  ;;  %1861 = vst [vmem:[%s2795_s27 + $0x18] sm:$0xff] %v1860_v35  ;;  %v1866_v39 = vld [vmem:[%s2799_s9 + $0x30] sm:$0xff] }
 0x453   : >> { %1863 = vst [vmem:[%s2795_s27 + $0x20] sm:$0xff] %v1862_v63  ;;  %1865 = vst [vmem:[%s2795_s27 + $0x28] sm:$0xff] %v1864_v58  ;;  %v1868_v26 = vld [vmem:[%s2799_s9 + $0x38] sm:$0xff]  ;;  %v1870_v36 = vld [vmem:[%s2799_s9 + $0x40] sm:$0xff]  ;;  %s3621_s18 = smov (%p1919_p11, %s1918_s18), 0 }
 0x454   : >> { %1867 = vst [vmem:[%s2795_s27 + $0x30] sm:$0xff] %v1866_v39  ;;  %1869 = vst [vmem:[%s2795_s27 + $0x38] sm:$0xff] %v1868_v26  ;;  %v1872_v18 = vld [vmem:[%s2799_s9 + $0x48] sm:$0xff]  ;;  %v1874_v41 = vld [vmem:[%s2799_s9 + $0x50] sm:$0xff]  ;;  %s2150_s20 = sshll.u32 %s3621_s18, 8  ;;  %s3614_s12 = smov %s3621_s18 }
 0x455   : >> { %1871 = vst [vmem:[%s2795_s27 + $0x40] sm:$0xff] %v1870_v36  ;;  %v1876_v8 = vld [vmem:[%s2799_s9 + $0x58] sm:$0xff]  ;;  %1873 = vst [vmem:[%s2795_s27 + $0x48] sm:$0xff] %v1872_v18  ;;  %v1878_v43 = vld [vmem:[%s2799_s9 + $0x60] sm:$0xff]  ;;  %s3542_s19 = scalar_lea.vmem %s3397_s30, %s2150_s20 [#allocation2]   ;;  %s1924_s21 = scalar_lea.vmem %s3469_s14, %s2150_s20  }
 0x456   : >> { %1875 = vst [vmem:[%s2795_s27 + $0x50] sm:$0xff] %v1874_v41  ;;  %1877 = vst [vmem:[%s2795_s27 + $0x58] sm:$0xff] %v1876_v8  ;;  %v1880_v10 = vld [vmem:[%s2799_s9 + $0x68] sm:$0xff]  ;;  %v1882_v44 = vld [vmem:[%s2799_s9 + $0x70] sm:$0xff] }
 0x457   : >> { %1879 = vst [vmem:[%s2795_s27 + $0x60] sm:$0xff] %v1878_v43  ;;  %1881 = vst [vmem:[%s2795_s27 + $0x68] sm:$0xff] %v1880_v10  ;;  %v1884_v1 = vld [vmem:[%s2799_s9 + $0x78] sm:$0xff]  ;;  %v1886_v14 = vld [vmem:[%s2799_s9 + $0x80] sm:$0xff] }
 0x458   : >> { %1883 = vst [vmem:[%s2795_s27 + $0x70] sm:$0xff] %v1882_v44  ;;  %v1888_v15 = vld [vmem:[%s2799_s9 + $0x88] sm:$0xff]  ;;  %1885 = vst [vmem:[%s2795_s27 + $0x78] sm:$0xff] %v1884_v1  ;;  %v1890_v47 = vld [vmem:[%s2799_s9 + $0x90] sm:$0xff] }
 0x459   : >> { %1887 = vst [vmem:[%s2795_s27 + $0x80] sm:$0xff] %v1886_v14  ;;  %1889 = vst [vmem:[%s2795_s27 + $0x88] sm:$0xff] %v1888_v15  ;;  %v1892_v11 = vld [vmem:[%s2799_s9 + $0x98] sm:$0xff]  ;;  %v1894_v56 = vld [vmem:[%s2799_s9 + $0xa0] sm:$0xff] }
 0x45a   : >> { %1891 = vst [vmem:[%s2795_s27 + $0x90] sm:$0xff] %v1890_v47  ;;  %1893 = vst [vmem:[%s2795_s27 + $0x98] sm:$0xff] %v1892_v11  ;;  %v1896_v17 = vld [vmem:[%s2799_s9 + $0xa8] sm:$0xff]  ;;  %v1898_v40 = vld [vmem:[%s2799_s9 + $0xb0] sm:$0xff]  ;;  %1850 = sbr.rel (!%p1847_p12) target bundleno = 1104 (0x450), region = 138 }
 0x45b   : >> { %1895 = vst [vmem:[%s2795_s27 + $0xa0] sm:$0xff] %v1894_v56  ;;  %v1900_v59 = vld [vmem:[%s2799_s9 + $0xb8] sm:$0xff]  ;;  %1897 = vst [vmem:[%s2795_s27 + $0xa8] sm:$0xff] %v1896_v17  ;;  %v1902_v12 = vld [vmem:[%s2799_s9 + $0xc0] sm:$0xff] }
 0x45c   : >> { %1899 = vst [vmem:[%s2795_s27 + $0xb0] sm:$0xff] %v1898_v40  ;;  %1901 = vst [vmem:[%s2795_s27 + $0xb8] sm:$0xff] %v1900_v59  ;;  %v1904_v29 = vld [vmem:[%s2799_s9 + $0xc8] sm:$0xff]  ;;  %v1906_v5 = vld [vmem:[%s2799_s9 + $0xd0] sm:$0xff] }
 0x45d   : >> { %1903 = vst [vmem:[%s2795_s27 + $0xc0] sm:$0xff] %v1902_v12  ;;  %1905 = vst [vmem:[%s2795_s27 + $0xc8] sm:$0xff] %v1904_v29  ;;  %v1908_v30 = vld [vmem:[%s2799_s9 + $0xd8] sm:$0xff]  ;;  %v1910_v4 = vld [vmem:[%s2799_s9 + $0xe0] sm:$0xff] }
 0x45e   : >> { %1907 = vst [vmem:[%s2795_s27 + $0xd0] sm:$0xff] %v1906_v5  ;;  %v1912_v2 = vld [vmem:[%s2799_s9 + $0xe8] sm:$0xff]  ;;  %1909 = vst [vmem:[%s2795_s27 + $0xd8] sm:$0xff] %v1908_v30  ;;  %v1914_v57 = vld [vmem:[%s2799_s9 + $0xf0] sm:$0xff] }
 0x45f   : >> { %1911 = vst [vmem:[%s2795_s27 + $0xe0] sm:$0xff] %v1910_v4  ;;  %1913 = vst [vmem:[%s2795_s27 + $0xe8] sm:$0xff] %v1912_v2  ;;  %v1916_v31 = vld [vmem:[%s2799_s9 + $0xf8] sm:$0xff]  ;;  %s3613_s9 = smov %s3542_s19 }
 0x460   : >> { %1915 = vst [vmem:[%s2795_s27 + $0xf0] sm:$0xff] %v1914_v57  ;;  %1917 = vst [vmem:[%s2795_s27 + $0xf8] sm:$0xff] %v1916_v31  ;;  %s3612_s27 = smov %s1924_s21 }
 0x461 PF: > { %s3583_s22 = sand.u32 31, %s3619_s24   ;;  %s2161_s23 = sshll.u32 %s3475_s16, 8 }
 0x462   : > { %s1929_s26 = scalar_lea.vmem %s3397_s30, %s2161_s23 [#allocation2]   ;;  %s1931_s29 = scalar_lea.vmem %s3469_s14, %s2161_s23  }
 0x463   : > { %p2155_p13 = scmp.le.s32.totalorder %s3583_s22, 0 }
 0x464   : > { %s2809_s10 = smov (!%p2155_p13), %s1931_s29   ;;  %s2813_s11 = smov (!%p2155_p13), %s1929_s26  }
 0x465   : > { %2022 = sbr.rel (%p2155_p13) target bundleno = 1142 (0x476), region = 143  ;;  %s2817_s13 = smov (!%p2155_p13), 0  }
 0x466   : > { %s2821_s15 = smov (!%p2155_p13), 0  }
 0x46c LB: >> { %v1941_v46 = vld [vmem:[%s2815_s11] sm:$0xff]  ;;  %s1943_s24 = sadd.s32 1, %s2819_s13  ;;  %s1935_s15 = sadd.s32 1, %s2823_s15   ;;  %s2823_s15 = sphi %s2821_s15, %s1935_s15   ;;  %s2819_s13 = sphi %s2817_s13, %s2818_s13   ;;  %s2815_s11 = sphi %s2813_s11, %s1948_s11   ;;  %s2811_s10 = sphi %s2809_s10, %s1949_s10  }
 0x46d   : >> { %1942 = vst [vmem:[%s2811_s10] sm:$0xff] %v1941_v46  ;;  %p1944_p0 = scmp.ge.s32.totalorder %s1943_s24, %s3583_s22  ;;  %p1934_p1 = scmp.ge.s32.totalorder %s1935_s15, %s3583_s22 }
 0x46f   : >> { %s3623_s24 = smov (%p1944_p0, %s1943_s24), 0  ;;  %1937 = sbr.rel (!%p1934_p1) target bundleno = 1132 (0x46c), region = 149 }
 0x470   : >> { %s2156_s30 = sshll.u32 %s3623_s24, 3  ;;  %s2818_s13 = smov %s3623_s24  }
 0x471   : >> { %s1948_s11 = scalar_lea.vmem %s1929_s26, %s2156_s30 [#allocation2]   ;;  %s1949_s10 = scalar_lea.vmem %s1931_s29, %s2156_s30  }
 0x476 PF: > { %p14_p2 = scmp.ge.s32.totalorder %s2880_s28, 4   ;;  %s3615_s24 = smov %s2787_s25 }
 0x477   : > { %s3616_s25 = smov %s2888_s8  ;;  %s3617_s26 = smov %s2880_s28 }
 0x478   :  { %16 = sbr.rel (!%p14_p2) target bundleno = 2 (0x2), region = 160 }

</bundles_post_ra>
